<compile_context>
chip_gen: v6e
topology: v6e:2x2x1
jax: 0.10.0
libtpu: 0.0.40
codegen_flags: <defaults>
</compile_context>

<pallas_src>
import math

import jax
import jax.numpy as jnp
from jax import lax
from jax.experimental import pallas as pl
from jax.experimental.pallas import tpu as pltpu


# ---------------- model config (small, consistent with the module) ----------
B = 2          # batch
T = 16         # sequence length (block_size)
C = 32         # n_embd
H = 4          # n_head
D = C // H     # head_dim = 8
N = B * T      # flattened tokens
EPS = 1e-5
NEG_INF = -1e30
SCALE = 1.0 / math.sqrt(D)

# packed small-vector layout: every segment padded to a 128-lane tile so every
# in-kernel slice starts on a lane-tile boundary (prefix read, no rotate).
_SEG = 128
OFF_LN1W = 0 * _SEG
OFF_LN1B = 1 * _SEG
OFF_BQKV = 2 * _SEG          # width 3C = 96
OFF_BAP  = 3 * _SEG
OFF_LN2W = 4 * _SEG
OFF_LN2B = 5 * _SEG
OFF_BFC  = 6 * _SEG          # width 4C = 128
OFF_BMP  = 7 * _SEG
VEC_LEN  = 8 * _SEG          # 1024 f32

# a @ b.T expressed as a contraction (no explicit transpose in the source;
# lowers to the MXU's transposed-operand form, no XLU transpose)
_TRANS_B_DIMS = (((1,), (1,)), ((), ()))


def _layernorm(h, w, b):
    mu = jnp.mean(h, axis=-1, keepdims=True)
    var = jnp.mean((h - mu) ** 2, axis=-1, keepdims=True)
    return (h - mu) * lax.rsqrt(var + EPS) * w + b


def _gelu_tanh(x):
    # GELU with tanh approximation (matches nn.GELU(approximate='tanh'))
    c = math.sqrt(2.0 / math.pi)
    return 0.5 * x * (1.0 + jnp.tanh(c * (x + 0.044715 * x * x * x)))


def block_kernel(x_ref, vec_ref, bias_ref,
                 wqkv_ref, wap_ref, wfc_ref, wmp_ref,
                 o_ref):
    # Single grid step: all B*T tokens and all weights are VMEM-resident.
    x = x_ref[...]                                          # (N, C) f32
    vec = vec_ref[0]                                        # (VEC_LEN,) f32
    bias = bias_ref[...]                                    # (N, N) f32 additive mask

    ln1_w = vec[OFF_LN1W:OFF_LN1W + C]
    ln1_b = vec[OFF_LN1B:OFF_LN1B + C]
    b_qkv = vec[OFF_BQKV:OFF_BQKV + 3 * C]
    b_ap  = vec[OFF_BAP:OFF_BAP + C]
    ln2_w = vec[OFF_LN2W:OFF_LN2W + C]
    ln2_b = vec[OFF_LN2B:OFF_LN2B + C]
    b_fc  = vec[OFF_BFC:OFF_BFC + 4 * C]
    b_mp  = vec[OFF_BMP:OFF_BMP + C]

    # ---- ln_1 + causal self-attention --------------------------------------
    h = _layernorm(x, ln1_w, ln1_b)                         # (N, C) f32
    qkv = jnp.dot(h.astype(jnp.bfloat16), wqkv_ref[...],
                  preferred_element_type=jnp.float32) + b_qkv   # (N, 3C)
    q = qkv[:, 0 * C:1 * C]                                 # SCALE folded into W_q/b_q
    k = qkv[:, 1 * C:2 * C]
    v = qkv[:, 2 * C:3 * C]

    # Per-head scores + softmax; the output projection is a single merged
    # matmul on the lane-concatenated head outputs (one MXU push, K=C).
    pv_heads = []
    for hd in range(H):                                     # H small & static -> unrolled
        sl = slice(hd * D, (hd + 1) * D)
        qh = q[:, sl].astype(jnp.bfloat16)                  # (N, D)
        kh = k[:, sl].astype(jnp.bfloat16)                  # (N, D)
        vh = v[:, sl].astype(jnp.bfloat16)                  # (N, D)
        s = lax.dot_general(qh, kh, _TRANS_B_DIMS,
                            preferred_element_type=jnp.float32) + bias   # (N, N)
        m = jnp.max(s, axis=-1, keepdims=True)
        p = jnp.exp(s - m)
        p = p * pl.reciprocal(jnp.sum(p, axis=-1, keepdims=True), approx=True)
        pv_heads.append(jnp.dot(p.astype(jnp.bfloat16), vh,
                                preferred_element_type=jnp.float32))     # (N, D)
    pv = jnp.concatenate(pv_heads, axis=-1)                 # (N, C) f32
    y = jnp.dot(pv.astype(jnp.bfloat16), wap_ref[...],
                preferred_element_type=jnp.float32) + b_ap  # (N, C)
    x = x + y                                               # residual 1

    # ---- ln_2 + MLP ---------------------------------------------------------
    h2 = _layernorm(x, ln2_w, ln2_b)                        # (N, C) f32
    a = jnp.dot(h2.astype(jnp.bfloat16), wfc_ref[...],
                preferred_element_type=jnp.float32) + b_fc  # (N, 4C)
    a = _gelu_tanh(a)                                       # f32 on VPU/EUP
    mo = jnp.dot(a.astype(jnp.bfloat16), wmp_ref[...],
                 preferred_element_type=jnp.float32) + b_mp # (N, C)

    o_ref[...] = (x + mo).astype(o_ref.dtype)               # residual 2


def _pad_to_tile(v):
    pad = (-v.shape[-1]) % _SEG
    return jnp.pad(v, ((0, 0), (0, pad)))


def prepare_params(p):
    """One-time param prep (outside jit): bf16 weight casts, SCALE folding,
    small-vector packing, additive attention-bias mask."""
    bf16 = jnp.bfloat16
    # fold 1/sqrt(D) into the q part of the QKV projection (weights AND bias)
    qscale = jnp.concatenate([jnp.full((C,), SCALE, jnp.float32),
                              jnp.ones((2 * C,), jnp.float32)])
    vec = jnp.concatenate([
        _pad_to_tile(p["ln1_w"]), _pad_to_tile(p["ln1_b"]),
        _pad_to_tile(p["b_qkv"] * qscale[None, :]), _pad_to_tile(p["b_attn_proj"]),
        _pad_to_tile(p["ln2_w"]), _pad_to_tile(p["ln2_b"]),
        _pad_to_tile(p["b_fc"]), _pad_to_tile(p["b_mlp_proj"]),
    ], axis=-1).astype(jnp.float32)                         # (1, VEC_LEN)
    assert vec.shape == (1, VEC_LEN)

    # block-diagonal causal additive bias over the flattened (B*T) tokens:
    # token r may attend to token c iff same sequence and c <= r.
    row = jnp.arange(N, dtype=jnp.int32)[:, None]
    col = jnp.arange(N, dtype=jnp.int32)[None, :]
    allowed = (row >= col) & ((row // T) == (col // T))
    attn_bias = jnp.where(allowed, 0.0, NEG_INF).astype(jnp.float32)   # (N, N)

    return {
        "vec": vec,
        "attn_bias": attn_bias,
        "w_qkv": (p["w_qkv"] * qscale[None, :]).astype(bf16),
        "w_attn_proj": p["w_attn_proj"].astype(bf16),
        "w_fc": p["w_fc"].astype(bf16),
        "w_mlp_proj": p["w_mlp_proj"].astype(bf16),
    }


@jax.jit
def gpt2_block(x, prep):
    """x: (B, T, C) float32. prep: output of prepare_params()."""
    Bx, Tx, Cx = x.shape
    assert (Bx, Tx, Cx) == (B, T, C)
    x2 = x.reshape(N, C)

    vmem = pl.BlockSpec(memory_space=pltpu.MemorySpace.VMEM)
    out = pl.pallas_call(
        block_kernel,
        out_shape=jax.ShapeDtypeStruct((N, C), x.dtype),
        in_specs=[vmem] * 7,
        out_specs=vmem,
    )(x2, prep["vec"], prep["attn_bias"],
      prep["w_qkv"], prep["w_attn_proj"], prep["w_fc"], prep["w_mlp_proj"])
    return out.reshape(B, T, C)


def init_params(key):
    """Deterministic synthetic parameters (PyTorch Linear stored pre-transposed
    as (in_features, out_features) so the kernel does x @ W + b)."""
    ks = jax.random.split(key, 4)
    std = 0.02
    return {
        "ln1_w": jnp.ones((1, C), jnp.float32),
        "ln1_b": jnp.zeros((1, C), jnp.float32),
        "w_qkv": std * jax.random.normal(ks[0], (C, 3 * C), jnp.float32),
        "b_qkv": jnp.zeros((1, 3 * C), jnp.float32),
        "w_attn_proj": std * jax.random.normal(ks[1], (C, C), jnp.float32),
        "b_attn_proj": jnp.zeros((1, C), jnp.float32),
        "ln2_w": jnp.ones((1, C), jnp.float32),
        "ln2_b": jnp.zeros((1, C), jnp.float32),
        "w_fc": std * jax.random.normal(ks[2], (C, 4 * C), jnp.float32),
        "b_fc": jnp.zeros((1, 4 * C), jnp.float32),
        "w_mlp_proj": std * jax.random.normal(ks[3], (4 * C, C), jnp.float32),
        "b_mlp_proj": jnp.zeros((1, C), jnp.float32),
    }


def reference_block(x, p):
    """Pure-JAX f32 reference of the PyTorch Block forward."""
    def ln(h, w, b):
        mu = jnp.mean(h, axis=-1, keepdims=True)
        var = jnp.mean((h - mu) ** 2, axis=-1, keepdims=True)
        return (h - mu) / jnp.sqrt(var + EPS) * w[0] + b[0]

    h = ln(x, p["ln1_w"], p["ln1_b"])
    qkv = h @ p["w_qkv"] + p["b_qkv"][0]
    q, k, v = jnp.split(qkv, 3, axis=-1)
    q = q.reshape(B, T, H, D).transpose(0, 2, 1, 3)
    k = k.reshape(B, T, H, D).transpose(0, 2, 1, 3)
    v = v.reshape(B, T, H, D).transpose(0, 2, 1, 3)
    scores = jnp.einsum("bhtd,bhsd->bhts", q, k) / math.sqrt(D)
    mask = jnp.tril(jnp.ones((T, T), bool))
    scores = jnp.where(mask, scores, -jnp.inf)
    pattn = jax.nn.softmax(scores, axis=-1)
    y = jnp.einsum("bhts,bhsd->bhtd", pattn, v)
    y = y.transpose(0, 2, 1, 3).reshape(B, T, C)
    y = y @ p["w_attn_proj"] + p["b_attn_proj"][0]
    x = x + y

    h2 = ln(x, p["ln2_w"], p["ln2_b"])
    h2 = h2 @ p["w_fc"] + p["b_fc"][0]
    c = math.sqrt(2.0 / math.pi)
    h2 = 0.5 * h2 * (1.0 + jnp.tanh(c * (h2 + 0.044715 * h2 ** 3)))
    h2 = h2 @ p["w_mlp_proj"] + p["b_mlp_proj"][0]
    return x + h2


if __name__ == "__main__":
    key = jax.random.PRNGKey(0)
    kx, kp = jax.random.split(key)
    x = jax.random.normal(kx, (B, T, C), jnp.float32)
    params = init_params(kp)
    prep = prepare_params(params)        # one-time: bf16 cast, pack, SCALE fold

    out = gpt2_block(x, prep)
    out = jax.block_until_ready(out)

    ref = reference_block(x, params)
    assert out.shape == (B, T, C)
    # bf16 MXU operands + approx reciprocal -> slightly looser tolerance vs
    # the pure-f32 reference.
    assert jnp.allclose(out, ref, atol=5e-3, rtol=5e-3), "mismatch vs reference"

    print("KERNEL_OK")
</pallas_src>

<mosaic_0001>
module attributes {stable_mosaic.version = 11 : i64} {
  func.func @block_kernel(%arg0: memref<32x32xf32, #tpu.memory_space<vmem>>, %arg1: memref<1x1024xf32, #tpu.memory_space<vmem>>, %arg2: memref<32x32xf32, #tpu.memory_space<vmem>>, %arg3: memref<32x96xbf16, #tpu.memory_space<vmem>>, %arg4: memref<32x32xbf16, #tpu.memory_space<vmem>>, %arg5: memref<32x128xbf16, #tpu.memory_space<vmem>>, %arg6: memref<128x32xbf16, #tpu.memory_space<vmem>>, %arg7: memref<32x32xf32, #tpu.memory_space<vmem>>) attributes {dimension_semantics = [], scalar_prefetch = 0 : i64, scratch_operands = 0 : i64, tpu.core_type = #tpu.core_type<tc>} {
    %c0 = arith.constant 0 : index
    %c0_0 = arith.constant 0 : index
    %0 = vector.load %arg0[%c0, %c0_0] : memref<32x32xf32, #tpu.memory_space<vmem>>, vector<32x32xf32>
    %c0_1 = arith.constant 0 : index
    %c0_2 = arith.constant 0 : index
    %1 = vector.load %arg1[%c0_1, %c0_2] : memref<1x1024xf32, #tpu.memory_space<vmem>>, vector<1x1024xf32>
    %2 = vector.shape_cast %1 : vector<1x1024xf32> to vector<1024xf32>
    %c0_3 = arith.constant 0 : index
    %c0_4 = arith.constant 0 : index
    %3 = vector.load %arg2[%c0_3, %c0_4] : memref<32x32xf32, #tpu.memory_space<vmem>>, vector<32x32xf32>
    %4 = vector.extract_strided_slice %2 {offsets = [0], sizes = [32], strides = [1]} : vector<1024xf32> to vector<32xf32>
    %5 = vector.extract_strided_slice %2 {offsets = [128], sizes = [32], strides = [1]} : vector<1024xf32> to vector<32xf32>
    %6 = vector.extract_strided_slice %2 {offsets = [256], sizes = [96], strides = [1]} : vector<1024xf32> to vector<96xf32>
    %7 = vector.extract_strided_slice %2 {offsets = [384], sizes = [32], strides = [1]} : vector<1024xf32> to vector<32xf32>
    %8 = vector.extract_strided_slice %2 {offsets = [512], sizes = [32], strides = [1]} : vector<1024xf32> to vector<32xf32>
    %9 = vector.extract_strided_slice %2 {offsets = [640], sizes = [32], strides = [1]} : vector<1024xf32> to vector<32xf32>
    %10 = vector.extract_strided_slice %2 {offsets = [768], sizes = [128], strides = [1]} : vector<1024xf32> to vector<128xf32>
    %11 = vector.extract_strided_slice %2 {offsets = [896], sizes = [32], strides = [1]} : vector<1024xf32> to vector<32xf32>
    %cst = arith.constant dense<0.000000e+00> : vector<32xf32>
    %12 = vector.multi_reduction <add>, %0, %cst [1] : vector<32x32xf32> to vector<32xf32>
    %13 = vector.shape_cast %12 : vector<32xf32> to vector<32x1xf32>
    %cst_5 = arith.constant 3.200000e+01 : f32
    %14 = vector.broadcast %cst_5 : f32 to vector<32x1xf32>
    %15 = arith.divf %13, %14 : vector<32x1xf32>
    %16 = vector.broadcast %15 : vector<32x1xf32> to vector<32x32xf32>
    %17 = arith.subf %0, %16 : vector<32x32xf32>
    %18 = arith.mulf %17, %17 : vector<32x32xf32>
    %cst_6 = arith.constant dense<0.000000e+00> : vector<32xf32>
    %19 = vector.multi_reduction <add>, %18, %cst_6 [1] : vector<32x32xf32> to vector<32xf32>
    %20 = vector.shape_cast %19 : vector<32xf32> to vector<32x1xf32>
    %cst_7 = arith.constant 3.200000e+01 : f32
    %21 = vector.broadcast %cst_7 : f32 to vector<32x1xf32>
    %22 = arith.divf %20, %21 : vector<32x1xf32>
    %23 = vector.broadcast %15 : vector<32x1xf32> to vector<32x32xf32>
    %24 = arith.subf %0, %23 : vector<32x32xf32>
    %cst_8 = arith.constant 9.99999974E-6 : f32
    %25 = vector.broadcast %cst_8 : f32 to vector<32x1xf32>
    %26 = arith.addf %22, %25 : vector<32x1xf32>
    %27 = math.rsqrt %26 : vector<32x1xf32>
    %28 = vector.broadcast %27 : vector<32x1xf32> to vector<32x32xf32>
    %29 = arith.mulf %24, %28 : vector<32x32xf32>
    %30 = vector.shape_cast %4 : vector<32xf32> to vector<1x32xf32>
    %31 = vector.broadcast %30 : vector<1x32xf32> to vector<32x32xf32>
    %32 = arith.mulf %29, %31 : vector<32x32xf32>
    %33 = vector.shape_cast %5 : vector<32xf32> to vector<1x32xf32>
    %34 = vector.broadcast %33 : vector<1x32xf32> to vector<32x32xf32>
    %35 = arith.addf %32, %34 : vector<32x32xf32>
    %36 = arith.truncf %35 : vector<32x32xf32> to vector<32x32xbf16>
    %c0_9 = arith.constant 0 : index
    %c0_10 = arith.constant 0 : index
    %37 = vector.load %arg3[%c0_9, %c0_10] : memref<32x96xbf16, #tpu.memory_space<vmem>>, vector<32x96xbf16>
    %cst_11 = arith.constant dense<0.000000e+00> : vector<32x96xf32>
    %38 = tpu.matmul %36, %37, %cst_11 {dimension_numbers = #tpu.dot_dimension_numbers<[1], [0], [0], [1], [0, 0, 1, 1], [], []>} : vector<32x32xbf16>, vector<32x96xbf16>, vector<32x96xf32> -> vector<32x96xf32>
    %39 = vector.shape_cast %6 : vector<96xf32> to vector<1x96xf32>
    %40 = vector.broadcast %39 : vector<1x96xf32> to vector<32x96xf32>
    %41 = arith.addf %38, %40 : vector<32x96xf32>
    %42 = vector.extract_strided_slice %41 {offsets = [0, 0], sizes = [32, 32], strides = [1, 1]} : vector<32x96xf32> to vector<32x32xf32>
    %43 = vector.extract_strided_slice %41 {offsets = [0, 32], sizes = [32, 32], strides = [1, 1]} : vector<32x96xf32> to vector<32x32xf32>
    %44 = vector.extract_strided_slice %41 {offsets = [0, 64], sizes = [32, 32], strides = [1, 1]} : vector<32x96xf32> to vector<32x32xf32>
    %45 = vector.extract_strided_slice %42 {offsets = [0, 0], sizes = [32, 8], strides = [1, 1]} : vector<32x32xf32> to vector<32x8xf32>
    %46 = arith.truncf %45 : vector<32x8xf32> to vector<32x8xbf16>
    %47 = vector.extract_strided_slice %43 {offsets = [0, 0], sizes = [32, 8], strides = [1, 1]} : vector<32x32xf32> to vector<32x8xf32>
    %48 = arith.truncf %47 : vector<32x8xf32> to vector<32x8xbf16>
    %49 = vector.extract_strided_slice %44 {offsets = [0, 0], sizes = [32, 8], strides = [1, 1]} : vector<32x32xf32> to vector<32x8xf32>
    %50 = arith.truncf %49 : vector<32x8xf32> to vector<32x8xbf16>
    %cst_12 = arith.constant dense<0.000000e+00> : vector<32x32xf32>
    %51 = tpu.matmul %46, %48, %cst_12 {dimension_numbers = #tpu.dot_dimension_numbers<[1], [1], [0], [0], [0, 0, 1, 0], [], []>} : vector<32x8xbf16>, vector<32x8xbf16>, vector<32x32xf32> -> vector<32x32xf32>
    %52 = arith.addf %51, %3 : vector<32x32xf32>
    %cst_13 = arith.constant dense<0xFF800000> : vector<32xf32>
    %53 = vector.multi_reduction <maximumf>, %52, %cst_13 [1] : vector<32x32xf32> to vector<32xf32>
    %54 = vector.shape_cast %53 : vector<32xf32> to vector<32x1xf32>
    %55 = vector.broadcast %54 : vector<32x1xf32> to vector<32x32xf32>
    %56 = arith.subf %52, %55 : vector<32x32xf32>
    %57 = math.exp %56 : vector<32x32xf32>
    %cst_14 = arith.constant dense<0.000000e+00> : vector<32xf32>
    %58 = vector.multi_reduction <add>, %57, %cst_14 [1] : vector<32x32xf32> to vector<32xf32>
    %59 = vector.shape_cast %58 : vector<32xf32> to vector<32x1xf32>
    %60 = tpu.reciprocal %59 {approx = true} : vector<32x1xf32> -> vector<32x1xf32>
    %61 = vector.broadcast %60 : vector<32x1xf32> to vector<32x32xf32>
    %62 = arith.mulf %57, %61 : vector<32x32xf32>
    %63 = arith.truncf %62 : vector<32x32xf32> to vector<32x32xbf16>
    %cst_15 = arith.constant dense<0.000000e+00> : vector<32x8xf32>
    %64 = tpu.matmul %63, %50, %cst_15 {dimension_numbers = #tpu.dot_dimension_numbers<[1], [0], [0], [1], [0, 0, 1, 1], [], []>} : vector<32x32xbf16>, vector<32x8xbf16>, vector<32x8xf32> -> vector<32x8xf32>
    %65 = vector.extract_strided_slice %42 {offsets = [0, 8], sizes = [32, 8], strides = [1, 1]} : vector<32x32xf32> to vector<32x8xf32>
    %66 = arith.truncf %65 : vector<32x8xf32> to vector<32x8xbf16>
    %67 = vector.extract_strided_slice %43 {offsets = [0, 8], sizes = [32, 8], strides = [1, 1]} : vector<32x32xf32> to vector<32x8xf32>
    %68 = arith.truncf %67 : vector<32x8xf32> to vector<32x8xbf16>
    %69 = vector.extract_strided_slice %44 {offsets = [0, 8], sizes = [32, 8], strides = [1, 1]} : vector<32x32xf32> to vector<32x8xf32>
    %70 = arith.truncf %69 : vector<32x8xf32> to vector<32x8xbf16>
    %cst_16 = arith.constant dense<0.000000e+00> : vector<32x32xf32>
    %71 = tpu.matmul %66, %68, %cst_16 {dimension_numbers = #tpu.dot_dimension_numbers<[1], [1], [0], [0], [0, 0, 1, 0], [], []>} : vector<32x8xbf16>, vector<32x8xbf16>, vector<32x32xf32> -> vector<32x32xf32>
    %72 = arith.addf %71, %3 : vector<32x32xf32>
    %cst_17 = arith.constant dense<0xFF800000> : vector<32xf32>
    %73 = vector.multi_reduction <maximumf>, %72, %cst_17 [1] : vector<32x32xf32> to vector<32xf32>
    %74 = vector.shape_cast %73 : vector<32xf32> to vector<32x1xf32>
    %75 = vector.broadcast %74 : vector<32x1xf32> to vector<32x32xf32>
    %76 = arith.subf %72, %75 : vector<32x32xf32>
    %77 = math.exp %76 : vector<32x32xf32>
    %cst_18 = arith.constant dense<0.000000e+00> : vector<32xf32>
    %78 = vector.multi_reduction <add>, %77, %cst_18 [1] : vector<32x32xf32> to vector<32xf32>
    %79 = vector.shape_cast %78 : vector<32xf32> to vector<32x1xf32>
    %80 = tpu.reciprocal %79 {approx = true} : vector<32x1xf32> -> vector<32x1xf32>
    %81 = vector.broadcast %80 : vector<32x1xf32> to vector<32x32xf32>
    %82 = arith.mulf %77, %81 : vector<32x32xf32>
    %83 = arith.truncf %82 : vector<32x32xf32> to vector<32x32xbf16>
    %cst_19 = arith.constant dense<0.000000e+00> : vector<32x8xf32>
    %84 = tpu.matmul %83, %70, %cst_19 {dimension_numbers = #tpu.dot_dimension_numbers<[1], [0], [0], [1], [0, 0, 1, 1], [], []>} : vector<32x32xbf16>, vector<32x8xbf16>, vector<32x8xf32> -> vector<32x8xf32>
    %85 = vector.extract_strided_slice %42 {offsets = [0, 16], sizes = [32, 8], strides = [1, 1]} : vector<32x32xf32> to vector<32x8xf32>
    %86 = arith.truncf %85 : vector<32x8xf32> to vector<32x8xbf16>
    %87 = vector.extract_strided_slice %43 {offsets = [0, 16], sizes = [32, 8], strides = [1, 1]} : vector<32x32xf32> to vector<32x8xf32>
    %88 = arith.truncf %87 : vector<32x8xf32> to vector<32x8xbf16>
    %89 = vector.extract_strided_slice %44 {offsets = [0, 16], sizes = [32, 8], strides = [1, 1]} : vector<32x32xf32> to vector<32x8xf32>
    %90 = arith.truncf %89 : vector<32x8xf32> to vector<32x8xbf16>
    %cst_20 = arith.constant dense<0.000000e+00> : vector<32x32xf32>
    %91 = tpu.matmul %86, %88, %cst_20 {dimension_numbers = #tpu.dot_dimension_numbers<[1], [1], [0], [0], [0, 0, 1, 0], [], []>} : vector<32x8xbf16>, vector<32x8xbf16>, vector<32x32xf32> -> vector<32x32xf32>
    %92 = arith.addf %91, %3 : vector<32x32xf32>
    %cst_21 = arith.constant dense<0xFF800000> : vector<32xf32>
    %93 = vector.multi_reduction <maximumf>, %92, %cst_21 [1] : vector<32x32xf32> to vector<32xf32>
    %94 = vector.shape_cast %93 : vector<32xf32> to vector<32x1xf32>
    %95 = vector.broadcast %94 : vector<32x1xf32> to vector<32x32xf32>
    %96 = arith.subf %92, %95 : vector<32x32xf32>
    %97 = math.exp %96 : vector<32x32xf32>
    %cst_22 = arith.constant dense<0.000000e+00> : vector<32xf32>
    %98 = vector.multi_reduction <add>, %97, %cst_22 [1] : vector<32x32xf32> to vector<32xf32>
    %99 = vector.shape_cast %98 : vector<32xf32> to vector<32x1xf32>
    %100 = tpu.reciprocal %99 {approx = true} : vector<32x1xf32> -> vector<32x1xf32>
    %101 = vector.broadcast %100 : vector<32x1xf32> to vector<32x32xf32>
    %102 = arith.mulf %97, %101 : vector<32x32xf32>
    %103 = arith.truncf %102 : vector<32x32xf32> to vector<32x32xbf16>
    %cst_23 = arith.constant dense<0.000000e+00> : vector<32x8xf32>
    %104 = tpu.matmul %103, %90, %cst_23 {dimension_numbers = #tpu.dot_dimension_numbers<[1], [0], [0], [1], [0, 0, 1, 1], [], []>} : vector<32x32xbf16>, vector<32x8xbf16>, vector<32x8xf32> -> vector<32x8xf32>
    %105 = vector.extract_strided_slice %42 {offsets = [0, 24], sizes = [32, 8], strides = [1, 1]} : vector<32x32xf32> to vector<32x8xf32>
    %106 = arith.truncf %105 : vector<32x8xf32> to vector<32x8xbf16>
    %107 = vector.extract_strided_slice %43 {offsets = [0, 24], sizes = [32, 8], strides = [1, 1]} : vector<32x32xf32> to vector<32x8xf32>
    %108 = arith.truncf %107 : vector<32x8xf32> to vector<32x8xbf16>
    %109 = vector.extract_strided_slice %44 {offsets = [0, 24], sizes = [32, 8], strides = [1, 1]} : vector<32x32xf32> to vector<32x8xf32>
    %110 = arith.truncf %109 : vector<32x8xf32> to vector<32x8xbf16>
    %cst_24 = arith.constant dense<0.000000e+00> : vector<32x32xf32>
    %111 = tpu.matmul %106, %108, %cst_24 {dimension_numbers = #tpu.dot_dimension_numbers<[1], [1], [0], [0], [0, 0, 1, 0], [], []>} : vector<32x8xbf16>, vector<32x8xbf16>, vector<32x32xf32> -> vector<32x32xf32>
    %112 = arith.addf %111, %3 : vector<32x32xf32>
    %cst_25 = arith.constant dense<0xFF800000> : vector<32xf32>
    %113 = vector.multi_reduction <maximumf>, %112, %cst_25 [1] : vector<32x32xf32> to vector<32xf32>
    %114 = vector.shape_cast %113 : vector<32xf32> to vector<32x1xf32>
    %115 = vector.broadcast %114 : vector<32x1xf32> to vector<32x32xf32>
    %116 = arith.subf %112, %115 : vector<32x32xf32>
    %117 = math.exp %116 : vector<32x32xf32>
    %cst_26 = arith.constant dense<0.000000e+00> : vector<32xf32>
    %118 = vector.multi_reduction <add>, %117, %cst_26 [1] : vector<32x32xf32> to vector<32xf32>
    %119 = vector.shape_cast %118 : vector<32xf32> to vector<32x1xf32>
    %120 = tpu.reciprocal %119 {approx = true} : vector<32x1xf32> -> vector<32x1xf32>
    %121 = vector.broadcast %120 : vector<32x1xf32> to vector<32x32xf32>
    %122 = arith.mulf %117, %121 : vector<32x32xf32>
    %123 = arith.truncf %122 : vector<32x32xf32> to vector<32x32xbf16>
    %cst_27 = arith.constant dense<0.000000e+00> : vector<32x8xf32>
    %124 = tpu.matmul %123, %110, %cst_27 {dimension_numbers = #tpu.dot_dimension_numbers<[1], [0], [0], [1], [0, 0, 1, 1], [], []>} : vector<32x32xbf16>, vector<32x8xbf16>, vector<32x8xf32> -> vector<32x8xf32>
    %125 = tpu.concatenate %64, %84, %104, %124 in 1 : vector<32x8xf32>, vector<32x8xf32>, vector<32x8xf32>, vector<32x8xf32> -> vector<32x32xf32>
    %126 = arith.truncf %125 : vector<32x32xf32> to vector<32x32xbf16>
    %c0_28 = arith.constant 0 : index
    %c0_29 = arith.constant 0 : index
    %127 = vector.load %arg4[%c0_28, %c0_29] : memref<32x32xbf16, #tpu.memory_space<vmem>>, vector<32x32xbf16>
    %cst_30 = arith.constant dense<0.000000e+00> : vector<32x32xf32>
    %128 = tpu.matmul %126, %127, %cst_30 {dimension_numbers = #tpu.dot_dimension_numbers<[1], [0], [0], [1], [0, 0, 1, 1], [], []>} : vector<32x32xbf16>, vector<32x32xbf16>, vector<32x32xf32> -> vector<32x32xf32>
    %129 = vector.shape_cast %7 : vector<32xf32> to vector<1x32xf32>
    %130 = vector.broadcast %129 : vector<1x32xf32> to vector<32x32xf32>
    %131 = arith.addf %128, %130 : vector<32x32xf32>
    %132 = arith.addf %0, %131 : vector<32x32xf32>
    %cst_31 = arith.constant dense<0.000000e+00> : vector<32xf32>
    %133 = vector.multi_reduction <add>, %132, %cst_31 [1] : vector<32x32xf32> to vector<32xf32>
    %134 = vector.shape_cast %133 : vector<32xf32> to vector<32x1xf32>
    %cst_32 = arith.constant 3.200000e+01 : f32
    %135 = vector.broadcast %cst_32 : f32 to vector<32x1xf32>
    %136 = arith.divf %134, %135 : vector<32x1xf32>
    %137 = vector.broadcast %136 : vector<32x1xf32> to vector<32x32xf32>
    %138 = arith.subf %132, %137 : vector<32x32xf32>
    %139 = arith.mulf %138, %138 : vector<32x32xf32>
    %cst_33 = arith.constant dense<0.000000e+00> : vector<32xf32>
    %140 = vector.multi_reduction <add>, %139, %cst_33 [1] : vector<32x32xf32> to vector<32xf32>
    %141 = vector.shape_cast %140 : vector<32xf32> to vector<32x1xf32>
    %cst_34 = arith.constant 3.200000e+01 : f32
    %142 = vector.broadcast %cst_34 : f32 to vector<32x1xf32>
    %143 = arith.divf %141, %142 : vector<32x1xf32>
    %144 = vector.broadcast %136 : vector<32x1xf32> to vector<32x32xf32>
    %145 = arith.subf %132, %144 : vector<32x32xf32>
    %cst_35 = arith.constant 9.99999974E-6 : f32
    %146 = vector.broadcast %cst_35 : f32 to vector<32x1xf32>
    %147 = arith.addf %143, %146 : vector<32x1xf32>
    %148 = math.rsqrt %147 : vector<32x1xf32>
    %149 = vector.broadcast %148 : vector<32x1xf32> to vector<32x32xf32>
    %150 = arith.mulf %145, %149 : vector<32x32xf32>
    %151 = vector.shape_cast %8 : vector<32xf32> to vector<1x32xf32>
    %152 = vector.broadcast %151 : vector<1x32xf32> to vector<32x32xf32>
    %153 = arith.mulf %150, %152 : vector<32x32xf32>
    %154 = vector.shape_cast %9 : vector<32xf32> to vector<1x32xf32>
    %155 = vector.broadcast %154 : vector<1x32xf32> to vector<32x32xf32>
    %156 = arith.addf %153, %155 : vector<32x32xf32>
    %157 = arith.truncf %156 : vector<32x32xf32> to vector<32x32xbf16>
    %c0_36 = arith.constant 0 : index
    %c0_37 = arith.constant 0 : index
    %158 = vector.load %arg5[%c0_36, %c0_37] : memref<32x128xbf16, #tpu.memory_space<vmem>>, vector<32x128xbf16>
    %cst_38 = arith.constant dense<0.000000e+00> : vector<32x128xf32>
    %159 = tpu.matmul %157, %158, %cst_38 {dimension_numbers = #tpu.dot_dimension_numbers<[1], [0], [0], [1], [0, 0, 1, 1], [], []>} : vector<32x32xbf16>, vector<32x128xbf16>, vector<32x128xf32> -> vector<32x128xf32>
    %160 = vector.shape_cast %10 : vector<128xf32> to vector<1x128xf32>
    %161 = vector.broadcast %160 : vector<1x128xf32> to vector<32x128xf32>
    %162 = arith.addf %159, %161 : vector<32x128xf32>
    %cst_39 = arith.constant 5.000000e-01 : f32
    %163 = vector.broadcast %cst_39 : f32 to vector<32x128xf32>
    %164 = arith.mulf %163, %162 : vector<32x128xf32>
    %cst_40 = arith.constant 4.471500e-02 : f32
    %165 = vector.broadcast %cst_40 : f32 to vector<32x128xf32>
    %166 = arith.mulf %165, %162 : vector<32x128xf32>
    %167 = arith.mulf %166, %162 : vector<32x128xf32>
    %168 = arith.mulf %167, %162 : vector<32x128xf32>
    %169 = arith.addf %162, %168 : vector<32x128xf32>
    %cst_41 = arith.constant 0.797884583 : f32
    %170 = vector.broadcast %cst_41 : f32 to vector<32x128xf32>
    %171 = arith.mulf %170, %169 : vector<32x128xf32>
    %172 = math.tanh %171 : vector<32x128xf32>
    %cst_42 = arith.constant 1.000000e+00 : f32
    %173 = vector.broadcast %cst_42 : f32 to vector<32x128xf32>
    %174 = arith.addf %173, %172 : vector<32x128xf32>
    %175 = arith.mulf %164, %174 : vector<32x128xf32>
    %176 = arith.truncf %175 : vector<32x128xf32> to vector<32x128xbf16>
    %c0_43 = arith.constant 0 : index
    %c0_44 = arith.constant 0 : index
    %177 = vector.load %arg6[%c0_43, %c0_44] : memref<128x32xbf16, #tpu.memory_space<vmem>>, vector<128x32xbf16>
    %cst_45 = arith.constant dense<0.000000e+00> : vector<32x32xf32>
    %178 = tpu.matmul %176, %177, %cst_45 {dimension_numbers = #tpu.dot_dimension_numbers<[1], [0], [0], [1], [0, 0, 1, 1], [], []>} : vector<32x128xbf16>, vector<128x32xbf16>, vector<32x32xf32> -> vector<32x32xf32>
    %179 = vector.shape_cast %11 : vector<32xf32> to vector<1x32xf32>
    %180 = vector.broadcast %179 : vector<1x32xf32> to vector<32x32xf32>
    %181 = arith.addf %178, %180 : vector<32x32xf32>
    %182 = arith.addf %132, %181 : vector<32x32xf32>
    %c0_46 = arith.constant 0 : index
    %c0_47 = arith.constant 0 : index
    %183 = vector.load %arg7[%c0_46, %c0_47] : memref<32x32xf32, #tpu.memory_space<vmem>>, vector<32x32xf32>
    tpu.vector_store %arg7[%c0_46, %c0_47], %182 {strides = array<i32>} : memref<32x32xf32, #tpu.memory_space<vmem>>, vector<32x32xf32>,
    return
  }
}

</mosaic_0001>

<bundles_post_ra>
// kernel: gpt2_block.1
= control target key start
LH: loop header
LB: loop body
LE: loop exit
PB: predicated region body
PF: predicated region fallthrough
CT: control target
= control target key end

     0   :  { %12 = vsyncpa [#allocation3], 0  ;;  %s2239_s0 = inlined_call_operand.vmem [shape: f32[32,32], index: 0, kind: input, shape index: {}]   ;;  %s2240_s1 = inlined_call_operand.hbm [shape: f32[1,1024], index: 1, kind: input, shape index: {}]   ;;  %s2241_s2 = inlined_call_operand.vmem [shape: f32[32,32], index: 2, kind: input, shape index: {}]   ;;  %s2242_s3 = inlined_call_operand.vmem [shape: bf16[32,96], index: 3, kind: input, shape index: {}]   ;;  %s2243_s4 = inlined_call_operand.hbm [shape: bf16[32,32], index: 4, kind: input, shape index: {}]   ;;  %s2244_s5 = inlined_call_operand.hbm [shape: bf16[32,128], index: 5, kind: input, shape index: {}]   ;;  %s2245_s6 = inlined_call_operand.vmem [shape: bf16[128,32], index: 6, kind: input, shape index: {}]   ;;  %s2246_s7 = inlined_call_operand.hbm [shape: f32[32,32], index: 7, kind: output, shape index: {}]  }
   0x1   :  { %13 = vsyncpa [#allocation6], 0 }
   0x2   :  { %14 = vsyncpa [#allocation4], 0  ;;  %s1862_s24 = smov [#allocation5]  }
   0x3   :  { %s36_s25 = sshll.u32 %s1862_s24, 4  ;;  %s37_s25 = int_to_ptr.vmem [resolvable:$true] %s36_s25 }
   0x4   :  { %s1784_s26 = scalar_lea.vmem %s37_s25, 256  ;;  %p1789_p1 = scmp.lt.s32.totalorder %s37_s25, %s37_s25 }
   0x5   :  { %p1785_p0 = scmp.ne.s32.totalorder %s37_s25, %s1784_s26  ;;  %p1790_p2 = scmp.lt.s32.totalorder %s1784_s26, %s1784_s26 }
   0x7   :  { %p1791_p3 = por %p1790_p2, %p1789_p1 }
   0x9   :  { %p1792_p4 = pnand %p1791_p3, %p1785_p0 }
   0xb   :  { %1795 = shalt.err (!%p1792_p4)
}
   0xc   :  { %s1863_s27 = smov 64   ;;  %s1864_s28 = smov 4  }
   0xd   :  { %42 = dma.hbm_to_vmem [thread:$0]  %s2243_s4, 256, %s37_s25, [#allocation6], %s1863_s27, %s1863_s27, %s1864_s28  }
   0xe   :  { %s1865_s8 = smov [#allocation2]   ;;  %s1866_s10 = smov [#allocation7]  }
   0xf   :  { %s23_s9 = sshll.u32 %s1865_s8, 4  ;;  %s48_s11 = sshll.u32 %s1866_s10, 4  ;;  %s24_s9 = int_to_ptr.vmem [resolvable:$true] %s23_s9  ;;  %s49_s11 = int_to_ptr.vmem [resolvable:$true] %s48_s11 }
  0x10   :  { %s1804_s12 = scalar_lea.vmem %s24_s9, 128  ;;  %p1809_p6 = scmp.lt.s32.totalorder %s24_s9, %s24_s9 }
  0x11   :  { %p1805_p5 = scmp.ne.s32.totalorder %s24_s9, %s1804_s12  ;;  %p1810_p7 = scmp.lt.s32.totalorder %s1804_s12, %s1804_s12 }
  0x13   :  { %p1811_p8 = por %p1810_p7, %p1809_p6 }
  0x15   :  { %p1812_p9 = pnand %p1811_p8, %p1805_p5 }
  0x17   :  { %1815 = shalt.err (!%p1812_p9)
}
  0x18   :  { %26 = dma.hbm_to_vmem [thread:$0]  %s2240_s1, 128, %s24_s9, [#allocation3]  }
  0x19   :  { %s1824_s15 = scalar_lea.vmem %s49_s11, 256  ;;  %p1829_p11 = scmp.lt.s32.totalorder %s49_s11, %s49_s11 }
  0x1a   :  { %p1825_p10 = scmp.ne.s32.totalorder %s49_s11, %s1824_s15  ;;  %p1830_p12 = scmp.lt.s32.totalorder %s1824_s15, %s1824_s15 }
  0x1c   :  { %p1831_p13 = por %p1830_p12, %p1829_p11 }
  0x1e   :  { %p1832_p0 = pnand %p1831_p13, %p1825_p10 }
  0x20   :  { %1835 = shalt.err (!%p1832_p0)
}
  0x21   :  { %54 = dma.hbm_to_vmem [thread:$0]  %s2244_s5, 256, %s49_s11, [#allocation6], %s1863_s27, %s1863_s27, %s1864_s28  }
  0x22   :  { %1856 = dma.done.wait [#allocation3], 128  }
  0x23   :  { %1857 = vsyncadd [#allocation3], 4294967168 }
  0x24   :  { %1858 = dma.done.wait [#allocation6], 512  }
  0x25   :  { %1859 = vsyncadd [#allocation6], 4294966784  ;;  %vm76_vm0 = vcmask 261120   ;;  %v67_v0 = vld [vmem:[%s2239_s0] sm:$0xff]  ;;  %v69_v1 = vld [vmem:[%s2239_s0 + $0x10] sm:$0xff]  ;;  %v131_v39 = vlaneseq  ;;  %vm237_vm1 = vcmask 64512  }
  0x26   :  { %v68_v2 = vld [vmem:[%s2239_s0 + $0x8] sm:$0xff]  ;;  %v77_v3 = vsel %vm76_vm0, %v67_v0, 0.0  ;;  %v83_v4 = vsel %vm76_vm0, %v69_v1, 0.0  ;;  %v70_v5 = vld [vmem:[%s2239_s0 + $0x18] sm:$0xff]  ;;  %v1670_v29 = vld [vmem:[%s2242_s3] sm:$0xff]   ;;  %s1869_s13 = smov 120  }
  0x27   :  { %78 = vadd.xlane.f32.xlu0 %v77_v3  ;;  %84 = vadd.xlane.f32.xlu1 %v83_v4  ;;  %v80_v6 = vsel %vm76_vm0, %v68_v2, 0.0  ;;  %v86_v7 = vsel %vm76_vm0, %v70_v5, 0.0  ;;  %v1669_v28 = vld [vmem:[%s2242_s3 + $0x8] sm:$0xff]   ;;  %v132_v43 = vshrl.u32 %v131_v39, 7  ;;  %v1963_v45 = vld [vmem:[#allocation2] sm:$0xff]  ;;  %s1867_s3 = smov 96  }
  0x28   :  { %1503 = vmatprep.subr.bf16.mxu0 %v1669_v28  ;;  %v140_v49 = vrot.slane %v1963_v45, 1  ;;  %v156_v3 = vrot.slane %v1963_v45, 2  ;;  %s1871_s14 = smov 80   ;;  %s1872_s15 = smov 112   ;;  %vm986_vm2 = vcmask 130048   ;;  %vm991_vm3 = vcmask 195584  }
  0x29   :  { %1504 = vmatpush3.bf16.msra.mxu0 %v1669_v28  ;;  %v1961_v44 = vsub.s32 0, %v132_v43  ;;  %v2008_v28 = vld [vmem:[%s2241_s2 + $0x10] sm:$0xff]  ;;  %s1873_s4 = smov 48   ;;  %s1874_s16 = smov 72  }
  0x2a   :  { %1505 = vmatprep.subr.bf16.mxu0 %v1670_v29  ;;  %s1875_s1 = smov 104   ;;  %s1876_s17 = smov 40  }
  0x2b   :  { %81 = vadd.xlane.f32.xlu0 %v80_v6  ;;  %87 = vadd.xlane.f32.xlu1 %v86_v7  ;;  %v134_v48 = vrot.slane %v1963_v45, %v1961_v44  ;;  %v144_v54 = vrot.slane %v140_v49, %v1961_v44  ;;  %s1877_s18 = smov 8   ;;  %s1878_s19 = smov 16  }
  0x2c   :  { %s1879_s20 = smov 24  }
  0x2d   :  { %1506 = vmatpush3.bf16.msra.mxu0 %v1670_v29 }
  0xb0   :  { %v79_v8 = vpop.xlane.xlu0 %78  ;;  %v85_v9 = vpop.xlane.xlu1 %84 }
  0xb1   :  { %v90_v10 = vmul.f32 0.03125, %v79_v8  ;;  %v92_v11 = vmul.f32 0.03125, %v85_v9 }
  0xb3   :  { %v94_v12 = vsub.f32 %v67_v0, %v90_v10  ;;  %v96_v13 = vsub.f32 %v69_v1, %v92_v11 }
  0xb4   :  { %v82_v14 = vpop.xlane.xlu0 %81  ;;  %v88_v15 = vpop.xlane.xlu1 %87 }
  0xb5   :  { %v91_v16 = vmul.f32 0.03125, %v82_v14  ;;  %v93_v17 = vmul.f32 0.03125, %v88_v15  ;;  %v98_v18 = vmul.f32 %v94_v12, %v94_v12  ;;  %v100_v19 = vmul.f32 %v96_v13, %v96_v13 }
  0xb7   :  { %v95_v20 = vsub.f32 %v68_v2, %v91_v16  ;;  %v97_v21 = vsub.f32 %v70_v5, %v93_v17  ;;  %v102_v22 = vsel %vm76_vm0, %v98_v18, 0.0  ;;  %v108_v23 = vsel %vm76_vm0, %v100_v19, 0.0 }
  0xb8   :  { %103 = vadd.xlane.f32.xlu0 %v102_v22  ;;  %v160_v5 = vrot.slane %v156_v3, %v1961_v44  ;;  %v1995_v22 = vld [vmem:[%s2241_s2 + $0x18] sm:$0xff] }
  0xb9   :  { %v99_v24 = vmul.f32 %v95_v20, %v95_v20  ;;  %v101_v25 = vmul.f32 %v97_v21, %v97_v21 }
  0xbb   :  { %v105_v26 = vsel %vm76_vm0, %v99_v24, 0.0  ;;  %v111_v27 = vsel %vm76_vm0, %v101_v25, 0.0  ;;  %v2001_v25 = vld [vmem:[%s2241_s2 + $0x8] sm:$0xff] }
  0xbc   :  { %109 = vadd.xlane.f32.xlu0 %v108_v23  ;;  %106 = vadd.xlane.f32.xlu1 %v105_v26 }
  0xc0   :  { %112 = vadd.xlane.f32.xlu1 %v111_v27 }
 0x141   :  { %v104_v30 = vpop.xlane.xlu0 %103 }
 0x142   :  { %v114_v31 = vmul.f32 0.03125, %v104_v30 }
 0x144   :  { %v118_v32 = vadd.f32 1e-05, %v114_v31 }
 0x145   :  { %v107_v33 = vpop.xlane.xlu1 %106  ;;  %v110_v34 = vpop.xlane.xlu0 %109 }
 0x146   :  { %1683 = vrsqrt.f32 %v118_v32  ;;  %v115_v35 = vmul.f32 0.03125, %v107_v33  ;;  %v116_v36 = vmul.f32 0.03125, %v110_v34 }
 0x148   :  { %v119_v37 = vadd.f32 1e-05, %v115_v35  ;;  %v120_v38 = vadd.f32 1e-05, %v116_v36 }
 0x149   :  { %v113_v40 = vpop.xlane.xlu1 %112 }
 0x14a   :  { %1685 = vrsqrt.f32 %v119_v37  ;;  %v117_v41 = vmul.f32 0.03125, %v113_v40 }
 0x14b   :  { %1687 = vrsqrt.f32 %v120_v38 }
 0x14c   :  { %v121_v42 = vadd.f32 1e-05, %v117_v41 }
 0x14e   :  { %1689 = vrsqrt.f32 %v121_v42 }
 0x153   :  { %v1684_v46 = vpop.eup %1683 }
 0x154   :  { %v126_v47 = vmul.f32 %v1684_v46, %v94_v12 }
 0x156   :  { %v136_v53 = vmul.f32 %v134_v48, %v126_v47 }
 0x157   :  { %v1686_v50 = vpop.eup %1685 }
 0x158   :  { %v1688_v51 = vpop.eup %1687  ;;  %v127_v52 = vmul.f32 %v1686_v50, %v95_v20  ;;  %v146_v58 = vadd.f32 %v144_v54, %v136_v53  ;;  %v1990_v20 = vld [vmem:[%s2241_s2] sm:$0xff]  ;;  %s1868_s2 = smov 88  }
 0x159   :  { %v128_v55 = vmul.f32 %v1688_v51, %v96_v13 }
 0x15a   :  { %v137_v56 = vmul.f32 %v134_v48, %v127_v52 }
 0x15b   :  { %v1690_v57 = vpop.eup %1689  ;;  %v138_v61 = vmul.f32 %v134_v48, %v128_v55 }
 0x15c   :  { %v147_v59 = vadd.f32 %v144_v54, %v137_v56  ;;  %v129_v60 = vmul.f32 %v1690_v57, %v97_v21 }
 0x15d   :  { %v148_v0 = vadd.f32 %v144_v54, %v138_v61 }
 0x15e   :  { %v150_v62 = vpack.c.bf16 %v147_v59, %v146_v58  ;;  %v139_v63 = vmul.f32 %v134_v48, %v129_v60 }
 0x160   :  { %1507 = vmatprep.mubr.msk.bf16.mxu0 %vm76_vm0, %v150_v62  ;;  %v149_v1 = vadd.f32 %v144_v54, %v139_v63 }
 0x162   :  { %v151_v2 = vpack.c.bf16 %v149_v1, %v148_v0 }
 0x164   :  { %1508 = vmatmul.mubr.msk.bf16.vlgmr.msra.gmra.mxu0 %vm76_vm0, %v151_v2 }
 0x224   :  { %v1509_v4 = vpop.f32.mrf.mxu0 }
 0x225   :  { %v223_v8 = vadd.f32 %v1509_v4, %v160_v5 }
 0x226   :  { %v214_v6 = vpop.f32.mrf.mxu0 }
 0x227   :  { %v215_v11 = vadd.f32 %v214_v6, %v160_v5 }
 0x228   :  { %v1510_v7 = vpop.f32.mrf.mxu0 }
 0x229   :  { %v226_v9 = vadd.f32 %v1510_v7, %v160_v5 }
 0x22a   :  { %v217_v10 = vpop.f32.mrf.mxu0 }
 0x22b   :  { %v1973_v12 = vpack.c.bf16 %v226_v9, %v223_v8  ;;  %v218_v13 = vadd.f32 %v217_v10, %v160_v5 }
 0x22d   :  { %v1975_v14 = vpack.c.bf16 %v218_v13, %v215_v11  ;;  %235 = vrot.lane.b32.xlu0 %v1973_v12, %s1867_s3 }
 0x22f   :  { %233 = vrot.lane.b32.xlu1 %v1975_v14, %s1867_s3  ;;  %1515 = vmatprep.mubr.msk.bf16.mxu0 %vm237_vm1, %v1975_v14 }
 0x29f   :  { %v236_v15 = vpop.permute.xlu0 %235 }
 0x2a0   :  { %v248_v16 = vsel %vm237_vm1, %v236_v15, 0  ;;  %1611 = vmatprep.subr.msk.bf16.mxu0 %vm237_vm1, %v236_v15 }
 0x2a1   :  { %1512 = vmatpush3.bf16.xpose.msra.mxu0 %v248_v16  ;;  %v234_v17 = vpop.permute.xlu1 %233 }
 0x2a2   :  { %1612 = vmatprep.subr.msk.bf16.mxu0 %vm237_vm1, %v234_v17  ;;  %v245_v18 = vsel %vm237_vm1, %v234_v17, 0 }
 0x2a9   :  { %1514 = vmatpush3.bf16.xpose.msra.mxu0 %v245_v18 }
 0x2b0   :  { %1516 = vmatmul.mubr.msk.bf16.vlgmr.msra.gmra.mxu0 %vm237_vm1, %v1973_v12 }
 0x370   :  { %v1517_v19 = vpop.f32.mrf.mxu0 }
 0x371   :  { %v293_v31 = vadd.f32 %v1517_v19, %v2008_v28 }
 0x372   :  { %v284_v21 = vpop.f32.mrf.mxu0 }
 0x373   :  { %v285_v23 = vadd.f32 %v284_v21, %v1990_v20  ;;  %v305_v34 = vsel %vm76_vm0, %v293_v31, -inf }
 0x374   :  { %v1518_v24 = vpop.f32.mrf.mxu0 }
 0x375   :  { %v296_v26 = vadd.f32 %v1518_v24, %v1995_v22  ;;  %v299_v27 = vsel %vm76_vm0, %v285_v23, -inf }
 0x376   :  { %v287_v29 = vpop.f32.mrf.mxu0  ;;  %300 = vmax.xlane.f32.xlu1 %v299_v27 }
 0x377   :  { %v288_v30 = vadd.f32 %v287_v29, %v2001_v25  ;;  %v308_v33 = vsel %vm76_vm0, %v296_v26, -inf }
 0x379   :  { %v302_v32 = vsel %vm76_vm0, %v288_v30, -inf }
 0x37a   :  { %303 = vmax.xlane.f32.xlu0 %v302_v32  ;;  %309 = vmax.xlane.f32.xlu1 %v308_v33 }
 0x37e   :  { %306 = vmax.xlane.f32.xlu0 %v305_v34 }
 0x38b   :  { %345 = vrot.lane.b32.xlu1 %v1975_v14, %s1863_s27 }
 0x3ff   :  { %v301_v35 = vpop.xlane.xlu1 %300 }
 0x400   :  { %v311_v40 = vsub.f32 %v285_v23, %v301_v35 }
 0x402   :  { %v315_v47 = vmul.f32 1.442695, %v311_v40 }
 0x403   :  { %v304_v36 = vpop.xlane.xlu0 %303  ;;  %v310_v37 = vpop.xlane.xlu1 %309 }
 0x404   :  { %v312_v38 = vsub.f32 %v288_v30, %v304_v36  ;;  %v314_v39 = vsub.f32 %v296_v26, %v310_v37 }
 0x406   :  { %v321_v41 = vmul.f32 1.442695, %v314_v39  ;;  %v317_v42 = vmul.f32 1.442695, %v312_v38 }
 0x407   :  { %v307_v43 = vpop.xlane.xlu0 %306  ;;  %v346_v57 = vpop.permute.xlu1 %345 }
 0x408   :  { %v313_v46 = vsub.f32 %v293_v31, %v307_v43  ;;  %1691 = vpow2.f32 %v321_v41 }
 0x409   :  { %1693 = vpow2.f32 %v317_v42 }
 0x40a   :  { %v319_v48 = vmul.f32 1.442695, %v313_v46 }
 0x40c   :  { %1695 = vpow2.f32 %v319_v48 }
 0x40d   :  { %1697 = vpow2.f32 %v315_v47 }
 0x415   :  { %v1692_v49 = vpop.eup %1691 }
 0x416   :  { %v332_v50 = vsel %vm76_vm0, %v1692_v49, 0.0  ;;  %v1694_v51 = vpop.eup %1693 }
 0x417   :  { %333 = vadd.xlane.f32.xlu1 %v332_v50  ;;  %v326_v55 = vsel %vm76_vm0, %v1694_v51, 0.0 }
 0x419   :  { %v1696_v52 = vpop.eup %1695 }
 0x41a   :  { %v329_v53 = vsel %vm76_vm0, %v1696_v52, 0.0  ;;  %v1698_v54 = vpop.eup %1697 }
 0x41b   :  { %330 = vadd.xlane.f32.xlu0 %v329_v53  ;;  %327 = vadd.xlane.f32.xlu1 %v326_v55  ;;  %v323_v56 = vsel %vm76_vm0, %v1698_v54, 0.0 }
 0x41f   :  { %324 = vadd.xlane.f32.xlu0 %v323_v56 }
 0x42c   :  { %412 = vrot.lane.b32.xlu1 %v1973_v12, %s1868_s2 }
 0x430   :  { %410 = vrot.lane.b32.xlu1 %v1975_v14, %s1868_s2 }
 0x434   :  { %408 = vrot.lane.b32.xlu1 %v1973_v12, %s1869_s13 }
 0x435   :  { %347 = vrot.lane.b32.xlu0 %v1973_v12, %s1863_s27  ;;  %s1870_s27 = smov 56  }
 0x439   :  { %406 = vrot.lane.b32.xlu0 %v1975_v14, %s1869_s13 }
 0x4a0   :  { %v334_v58 = vpop.xlane.xlu1 %333 }
 0x4a4   :  { %v331_v59 = vpop.xlane.xlu0 %330  ;;  %v328_v60 = vpop.xlane.xlu1 %327 }
 0x4a5   :  { %1699 = vrcp.f32 %v331_v59 }
 0x4a6   :  { %1701 = vrcp.f32 %v328_v60 }
 0x4a7   :  { %1703 = vrcp.f32 %v334_v58 }
 0x4a8   :  { %v325_v61 = vpop.xlane.xlu0 %324  ;;  %v413_v63 = vpop.permute.xlu1 %412 }
 0x4a9   :  { %1705 = vrcp.f32 %v325_v61  ;;  %v424_v10 = vsel %vm237_vm1, %v413_v63, 0 }
 0x4ac   :  { %v348_v62 = vpop.permute.xlu0 %347  ;;  %v411_v13 = vpop.permute.xlu1 %410 }
 0x4ad   :  { %1519 = vmatprep.subr.bf16.mxu0 %v348_v62  ;;  %v421_v15 = vsel %vm237_vm1, %v411_v13, 0 }
 0x4ae   :  { %1520 = vmatpush3.bf16.msra.mxu0 %v348_v62 }
 0x4af   :  { %1521 = vmatprep.subr.bf16.mxu0 %v346_v57 }
 0x4b0   :  { %v407_v11 = vpop.permute.xlu0 %406  ;;  %v409_v16 = vpop.permute.xlu1 %408 }
 0x4b2   :  { %1522 = vmatpush3.bf16.msra.mxu0 %v346_v57  ;;  %v1700_v0 = vpop.eup %1699 }
 0x4b3   :  { %1613 = vmatprep.subr.msk.bf16.mxu0 %vm237_vm1, %v413_v63  ;;  %v1702_v1 = vpop.eup %1701  ;;  %v341_v4 = vmul.f32 %v1700_v0, %v1696_v52 }
 0x4b4   :  { %v1704_v2 = vpop.eup %1703  ;;  %v340_v6 = vmul.f32 %v1702_v1, %v1694_v51 }
 0x4b5   :  { %v342_v7 = vmul.f32 %v1704_v2, %v1692_v49 }
 0x4b6   :  { %v1706_v3 = vpop.eup %1705 }
 0x4b7   :  { %v339_v5 = vmul.f32 %v1706_v3, %v1698_v54  ;;  %v344_v9 = vpack.c.bf16 %v342_v7, %v341_v4 }
 0x4b9   :  { %v343_v8 = vpack.c.bf16 %v340_v6, %v339_v5 }
 0x4bb   :  { %1523 = vmatprep.mubr.msk.bf16.mxu0 %vm76_vm0, %v343_v8 }
 0x4bc   :  { %1524 = vmatmul.mubr.msk.bf16.vlgmr.msra.gmra.mxu0 %vm76_vm0, %v344_v9 }
 0x4bd   :  { %1528 = vmatpush3.bf16.xpose.msra.mxu0 %v424_v10  ;;  %1531 = vmatprep.mubr.msk.bf16.mxu0 %vm237_vm1, %v407_v11 }
 0x4be   :  { %1614 = vmatprep.subr.msk.bf16.mxu0 %vm237_vm1, %v411_v13 }
 0x4c5   :  { %1530 = vmatpush3.bf16.xpose.msra.mxu0 %v421_v15 }
 0x4cc   :  { %1532 = vmatmul.mubr.msk.bf16.vlgmr.msra.gmra.mxu0 %vm237_vm1, %v409_v16 }
 0x57c   :  { %v2035_v17 = vpop.f32.mrf.mxu0 }
 0x57e   :  { %v2037_v18 = vpop.f32.mrf.mxu0 }
 0x580   :  { %v2039_v19 = vpop.f32.mrf.mxu0 }
 0x582   :  { %v2041_v21 = vpop.f32.mrf.mxu0 }
 0x58c   :  { %v1533_v23 = vpop.f32.mrf.mxu0 }
 0x58d   :  { %v469_v29 = vadd.f32 %v1533_v23, %v2008_v28 }
 0x58e   :  { %v460_v24 = vpop.f32.mrf.mxu0 }
 0x58f   :  { %v461_v26 = vadd.f32 %v460_v24, %v1990_v20  ;;  %v481_v35 = vsel %vm76_vm0, %v469_v29, -inf }
 0x590   :  { %v1534_v27 = vpop.f32.mrf.mxu0 }
 0x591   :  { %v475_v30 = vsel %vm76_vm0, %v461_v26, -inf  ;;  %v472_v33 = vadd.f32 %v1534_v27, %v1995_v22 }
 0x592   :  { %v463_v31 = vpop.f32.mrf.mxu0  ;;  %476 = vmax.xlane.f32.xlu0 %v475_v30 }
 0x593   :  { %v464_v32 = vadd.f32 %v463_v31, %v2001_v25  ;;  %v484_v36 = vsel %vm76_vm0, %v472_v33, -inf }
 0x595   :  { %v478_v34 = vsel %vm76_vm0, %v464_v32, -inf }
 0x596   :  { %479 = vmax.xlane.f32.xlu1 %v478_v34  ;;  %482 = vmax.xlane.f32.xlu0 %v481_v35 }
 0x59a   :  { %485 = vmax.xlane.f32.xlu0 %v484_v36 }
 0x5a7   :  { %521 = vrot.lane.b32.xlu1 %v1975_v14, %s1870_s27 }
 0x61b   :  { %v477_v37 = vpop.xlane.xlu0 %476 }
 0x61c   :  { %v487_v38 = vsub.f32 %v461_v26, %v477_v37 }
 0x61e   :  { %v491_v46 = vmul.f32 1.442695, %v487_v38 }
 0x61f   :  { %v480_v39 = vpop.xlane.xlu1 %479  ;;  %v483_v40 = vpop.xlane.xlu0 %482 }
 0x620   :  { %v489_v41 = vsub.f32 %v469_v29, %v483_v40  ;;  %v488_v42 = vsub.f32 %v464_v32, %v480_v39 }
 0x622   :  { %v495_v43 = vmul.f32 1.442695, %v489_v41  ;;  %v493_v49 = vmul.f32 1.442695, %v488_v42 }
 0x623   :  { %v486_v47 = vpop.xlane.xlu0 %485  ;;  %v522_v59 = vpop.permute.xlu1 %521 }
 0x624   :  { %v490_v48 = vsub.f32 %v472_v33, %v486_v47  ;;  %1707 = vpow2.f32 %v495_v43 }
 0x625   :  { %1709 = vpow2.f32 %v491_v46 }
 0x626   :  { %v497_v50 = vmul.f32 1.442695, %v490_v48 }
 0x628   :  { %1711 = vpow2.f32 %v497_v50 }
 0x629   :  { %1713 = vpow2.f32 %v493_v49 }
 0x631   :  { %v1708_v51 = vpop.eup %1707 }
 0x632   :  { %v505_v52 = vsel %vm76_vm0, %v1708_v51, 0.0  ;;  %v1710_v53 = vpop.eup %1709 }
 0x633   :  { %506 = vadd.xlane.f32.xlu0 %v505_v52  ;;  %v499_v57 = vsel %vm76_vm0, %v1710_v53, 0.0 }
 0x635   :  { %v1712_v54 = vpop.eup %1711 }
 0x636   :  { %v508_v55 = vsel %vm76_vm0, %v1712_v54, 0.0  ;;  %v1714_v56 = vpop.eup %1713 }
 0x637   :  { %509 = vadd.xlane.f32.xlu1 %v508_v55  ;;  %500 = vadd.xlane.f32.xlu0 %v499_v57  ;;  %v502_v58 = vsel %vm76_vm0, %v1714_v56, 0.0 }
 0x63b   :  { %503 = vadd.xlane.f32.xlu1 %v502_v58 }
 0x64c   :  { %588 = vrot.lane.b32.xlu1 %v1973_v12, %s1871_s14 }
 0x64d   :  { %523 = vrot.lane.b32.xlu0 %v1973_v12, %s1870_s27 }
 0x650   :  { %586 = vrot.lane.b32.xlu1 %v1975_v14, %s1871_s14 }
 0x651   :  { %582 = vrot.lane.b32.xlu0 %v1975_v14, %s1872_s15 }
 0x654   :  { %584 = vrot.lane.b32.xlu1 %v1973_v12, %s1872_s15 }
 0x6bc   :  { %v507_v60 = vpop.xlane.xlu0 %506 }
 0x6c0   :  { %v510_v61 = vpop.xlane.xlu1 %509  ;;  %v501_v62 = vpop.xlane.xlu0 %500 }
 0x6c1   :  { %1715 = vrcp.f32 %v510_v61 }
 0x6c2   :  { %1717 = vrcp.f32 %v501_v62 }
 0x6c3   :  { %1719 = vrcp.f32 %v507_v60 }
 0x6c4   :  { %v504_v63 = vpop.xlane.xlu1 %503  ;;  %v524_v0 = vpop.permute.xlu0 %523 }
 0x6c5   :  { %1721 = vrcp.f32 %v504_v63  ;;  %1535 = vmatprep.subr.bf16.mxu1 %v524_v0 }
 0x6c6   :  { %1536 = vmatpush3.bf16.msra.mxu1 %v524_v0 }
 0x6c7   :  { %1537 = vmatprep.subr.bf16.mxu1 %v522_v59 }
 0x6c8   :  { %v589_v1 = vpop.permute.xlu1 %588  ;;  %v583_v15 = vpop.permute.xlu0 %582 }
 0x6c9   :  { %v600_v13 = vsel %vm237_vm1, %v589_v1, 0 }
 0x6ca   :  { %1538 = vmatpush3.bf16.msra.mxu1 %v522_v59 }
 0x6cb   :  { %1615 = vmatprep.subr.msk.bf16.mxu1 %vm237_vm1, %v589_v1 }
 0x6cc   :  { %v587_v16 = vpop.permute.xlu1 %586 }
 0x6cd   :  { %v597_v23 = vsel %vm237_vm1, %v587_v16, 0 }
 0x6ce   :  { %v1716_v2 = vpop.eup %1715 }
 0x6cf   :  { %v1718_v3 = vpop.eup %1717  ;;  %v518_v6 = vmul.f32 %v1716_v2, %v1712_v54 }
 0x6d0   :  { %v1720_v4 = vpop.eup %1719  ;;  %v515_v7 = vmul.f32 %v1718_v3, %v1710_v53  ;;  %v585_v24 = vpop.permute.xlu1 %584 }
 0x6d1   :  { %v517_v9 = vmul.f32 %v1720_v4, %v1708_v51 }
 0x6d2   :  { %v1722_v5 = vpop.eup %1721 }
 0x6d3   :  { %v516_v8 = vmul.f32 %v1722_v5, %v1714_v56  ;;  %v520_v11 = vpack.c.bf16 %v518_v6, %v517_v9 }
 0x6d5   :  { %v519_v10 = vpack.c.bf16 %v516_v8, %v515_v7 }
 0x6d7   :  { %1539 = vmatprep.mubr.msk.bf16.mxu1 %vm76_vm0, %v519_v10 }
 0x6d8   :  { %1540 = vmatmul.mubr.msk.bf16.vlgmr.msra.gmra.mxu1 %vm76_vm0, %v520_v11 }
 0x6d9   :  { %1544 = vmatpush3.bf16.xpose.msra.mxu1 %v600_v13  ;;  %1547 = vmatprep.mubr.msk.bf16.mxu1 %vm237_vm1, %v583_v15 }
 0x6da   :  { %1616 = vmatprep.subr.msk.bf16.mxu1 %vm237_vm1, %v587_v16 }
 0x6e1   :  { %1546 = vmatpush3.bf16.xpose.msra.mxu1 %v597_v23 }
 0x6e8   :  { %1548 = vmatmul.mubr.msk.bf16.vlgmr.msra.gmra.mxu1 %vm237_vm1, %v585_v24 }
 0x798   :  { %v2071_v26 = vpop.f32.mrf.mxu1 }
 0x79a   :  { %v2073_v27 = vpop.f32.mrf.mxu1 }
 0x79c   :  { %v2075_v29 = vpop.f32.mrf.mxu1 }
 0x79d   :  { %v1644_v30 = vpack.i.bf16 %v2075_v29, %v2071_v26 }
 0x79e   :  { %v2079_v31 = vpop.f32.mrf.mxu1 }
 0x79f   :  { %v1639_v32 = vpack.i.bf16 %v2079_v31, %v2073_v27 }
 0x7a8   :  { %v1549_v33 = vpop.f32.mrf.mxu1 }
 0x7a9   :  { %v645_v37 = vadd.f32 %v1549_v33, %v2008_v28 }
 0x7aa   :  { %v636_v34 = vpop.f32.mrf.mxu1 }
 0x7ab   :  { %v637_v35 = vadd.f32 %v636_v34, %v1990_v20  ;;  %v657_v43 = vsel %vm76_vm0, %v645_v37, -inf }
 0x7ac   :  { %v1550_v36 = vpop.f32.mrf.mxu1 }
 0x7ad   :  { %v651_v38 = vsel %vm76_vm0, %v637_v35, -inf  ;;  %v648_v41 = vadd.f32 %v1550_v36, %v1995_v22 }
 0x7ae   :  { %v639_v39 = vpop.f32.mrf.mxu1  ;;  %652 = vmax.xlane.f32.xlu0 %v651_v38 }
 0x7af   :  { %v640_v40 = vadd.f32 %v639_v39, %v2001_v25  ;;  %v660_v46 = vsel %vm76_vm0, %v648_v41, -inf }
 0x7b1   :  { %v654_v42 = vsel %vm76_vm0, %v640_v40, -inf }
 0x7b2   :  { %655 = vmax.xlane.f32.xlu1 %v654_v42  ;;  %658 = vmax.xlane.f32.xlu0 %v657_v43 }
 0x7b6   :  { %661 = vmax.xlane.f32.xlu0 %v660_v46 }
 0x7c3   :  { %697 = vrot.lane.b32.xlu1 %v1975_v14, %s1873_s4 }
 0x837   :  { %v653_v47 = vpop.xlane.xlu0 %652 }
 0x838   :  { %v663_v48 = vsub.f32 %v637_v35, %v653_v47 }
 0x83a   :  { %v667_v54 = vmul.f32 1.442695, %v663_v48 }
 0x83b   :  { %v656_v49 = vpop.xlane.xlu1 %655  ;;  %v659_v50 = vpop.xlane.xlu0 %658 }
 0x83c   :  { %v665_v51 = vsub.f32 %v645_v37, %v659_v50  ;;  %v664_v52 = vsub.f32 %v640_v40, %v656_v49 }
 0x83e   :  { %v671_v53 = vmul.f32 1.442695, %v665_v51  ;;  %v669_v57 = vmul.f32 1.442695, %v664_v52 }
 0x83f   :  { %v662_v55 = vpop.xlane.xlu0 %661  ;;  %v698_v3 = vpop.permute.xlu1 %697 }
 0x840   :  { %v666_v56 = vsub.f32 %v648_v41, %v662_v55  ;;  %1723 = vpow2.f32 %v671_v53 }
 0x841   :  { %1725 = vpow2.f32 %v667_v54 }
 0x842   :  { %v673_v58 = vmul.f32 1.442695, %v666_v56 }
 0x844   :  { %1727 = vpow2.f32 %v673_v58 }
 0x845   :  { %1729 = vpow2.f32 %v669_v57 }
 0x84d   :  { %v1724_v59 = vpop.eup %1723 }
 0x84e   :  { %v681_v60 = vsel %vm76_vm0, %v1724_v59, 0.0  ;;  %v1726_v61 = vpop.eup %1725 }
 0x84f   :  { %682 = vadd.xlane.f32.xlu0 %v681_v60  ;;  %v675_v1 = vsel %vm76_vm0, %v1726_v61, 0.0 }
 0x851   :  { %v1728_v62 = vpop.eup %1727 }
 0x852   :  { %v684_v63 = vsel %vm76_vm0, %v1728_v62, 0.0  ;;  %v1730_v0 = vpop.eup %1729 }
 0x853   :  { %685 = vadd.xlane.f32.xlu1 %v684_v63  ;;  %676 = vadd.xlane.f32.xlu0 %v675_v1  ;;  %v678_v2 = vsel %vm76_vm0, %v1730_v0, 0.0 }
 0x857   :  { %679 = vadd.xlane.f32.xlu1 %v678_v2 }
 0x868   :  { %764 = vrot.lane.b32.xlu1 %v1973_v12, %s1874_s16 }
 0x869   :  { %699 = vrot.lane.b32.xlu0 %v1973_v12, %s1873_s4 }
 0x86c   :  { %762 = vrot.lane.b32.xlu1 %v1975_v14, %s1874_s16 }
 0x86d   :  { %758 = vrot.lane.b32.xlu0 %v1975_v14, %s1875_s1 }
 0x870   :  { %760 = vrot.lane.b32.xlu1 %v1973_v12, %s1875_s1 }
 0x8d8   :  { %v683_v4 = vpop.xlane.xlu0 %682 }
 0x8dc   :  { %v686_v5 = vpop.xlane.xlu1 %685  ;;  %v677_v6 = vpop.xlane.xlu0 %676 }
 0x8dd   :  { %1731 = vrcp.f32 %v686_v5 }
 0x8de   :  { %1733 = vrcp.f32 %v677_v6 }
 0x8df   :  { %1735 = vrcp.f32 %v683_v4 }
 0x8e0   :  { %v680_v7 = vpop.xlane.xlu1 %679  ;;  %v700_v8 = vpop.permute.xlu0 %699 }
 0x8e1   :  { %1737 = vrcp.f32 %v680_v7  ;;  %1551 = vmatprep.subr.bf16.mxu0 %v700_v8 }
 0x8e2   :  { %1552 = vmatpush3.bf16.msra.mxu0 %v700_v8 }
 0x8e3   :  { %1553 = vmatprep.subr.bf16.mxu0 %v698_v3 }
 0x8e4   :  { %v765_v9 = vpop.permute.xlu1 %764  ;;  %v759_v37 = vpop.permute.xlu0 %758 }
 0x8e5   :  { %v776_v36 = vsel %vm237_vm1, %v765_v9, 0 }
 0x8e6   :  { %1554 = vmatpush3.bf16.msra.mxu0 %v698_v3 }
 0x8e7   :  { %1617 = vmatprep.subr.msk.bf16.mxu0 %vm237_vm1, %v765_v9 }
 0x8e8   :  { %v763_v38 = vpop.permute.xlu1 %762 }
 0x8e9   :  { %v773_v39 = vsel %vm237_vm1, %v763_v38, 0 }
 0x8ea   :  { %v1732_v10 = vpop.eup %1731 }
 0x8eb   :  { %v1734_v11 = vpop.eup %1733  ;;  %v694_v16 = vmul.f32 %v1732_v10, %v1728_v62 }
 0x8ec   :  { %v1736_v13 = vpop.eup %1735  ;;  %v691_v23 = vmul.f32 %v1734_v11, %v1726_v61  ;;  %v761_v40 = vpop.permute.xlu1 %760 }
 0x8ed   :  { %v693_v33 = vmul.f32 %v1736_v13, %v1724_v59 }
 0x8ee   :  { %v1738_v15 = vpop.eup %1737 }
 0x8ef   :  { %v692_v24 = vmul.f32 %v1738_v15, %v1730_v0  ;;  %v696_v35 = vpack.c.bf16 %v694_v16, %v693_v33 }
 0x8f1   :  { %v695_v34 = vpack.c.bf16 %v692_v24, %v691_v23 }
 0x8f3   :  { %1555 = vmatprep.mubr.msk.bf16.mxu0 %vm76_vm0, %v695_v34 }
 0x8f4   :  { %1556 = vmatmul.mubr.msk.bf16.vlgmr.msra.gmra.mxu0 %vm76_vm0, %v696_v35 }
 0x8f5   :  { %1560 = vmatpush3.bf16.xpose.msra.mxu0 %v776_v36  ;;  %1563 = vmatprep.mubr.msk.bf16.mxu0 %vm237_vm1, %v759_v37  ;;  %v1671_v37 = vld [vmem:[#allocation5 + $0x8] sm:$0xff]  }
 0x8f6   :  { %1618 = vmatprep.subr.msk.bf16.mxu0 %vm237_vm1, %v763_v38  ;;  %v1672_v38 = vld [vmem:[#allocation5] sm:$0xff]  }
 0x8fd   :  { %1562 = vmatpush3.bf16.xpose.msra.mxu0 %v773_v39 }
 0x904   :  { %1564 = vmatmul.mubr.msk.bf16.vlgmr.msra.gmra.mxu0 %vm237_vm1, %v761_v40 }
 0x9b4   :  { %v1557_v41 = vpop.f32.mrf.mxu0 }
 0x9b6   :  { %v743_v42 = vpop.f32.mrf.mxu0 }
 0x9b8   :  { %v1558_v43 = vpop.f32.mrf.mxu0 }
 0x9b9   :  { %v1654_v46 = vpack.i.bf16 %v1558_v43, %v1557_v41 }
 0x9ba   :  { %v746_v47 = vpop.f32.mrf.mxu0 }
 0x9bb   :  { %v1649_v48 = vpack.i.bf16 %v746_v47, %v743_v42 }
 0x9c4   :  { %v1565_v49 = vpop.f32.mrf.mxu0 }
 0x9c5   :  { %v821_v53 = vadd.f32 %v1565_v49, %v2008_v28 }
 0x9c6   :  { %v812_v50 = vpop.f32.mrf.mxu0 }
 0x9c7   :  { %v813_v51 = vadd.f32 %v812_v50, %v1990_v20  ;;  %v833_v59 = vsel %vm76_vm0, %v821_v53, -inf }
 0x9c8   :  { %v1566_v52 = vpop.f32.mrf.mxu0 }
 0x9c9   :  { %v827_v54 = vsel %vm76_vm0, %v813_v51, -inf  ;;  %v824_v57 = vadd.f32 %v1566_v52, %v1995_v22 }
 0x9ca   :  { %v815_v55 = vpop.f32.mrf.mxu0  ;;  %828 = vmax.xlane.f32.xlu0 %v827_v54 }
 0x9cb   :  { %v816_v56 = vadd.f32 %v815_v55, %v2001_v25  ;;  %v836_v60 = vsel %vm76_vm0, %v824_v57, -inf }
 0x9cd   :  { %v830_v58 = vsel %vm76_vm0, %v816_v56, -inf }
 0x9ce   :  { %831 = vmax.xlane.f32.xlu1 %v830_v58  ;;  %834 = vmax.xlane.f32.xlu0 %v833_v59 }
 0x9d2   :  { %837 = vmax.xlane.f32.xlu0 %v836_v60 }
 0xa53   :  { %v829_v20 = vpop.xlane.xlu0 %828 }
 0xa54   :  { %v839_v61 = vsub.f32 %v813_v51, %v829_v20 }
 0xa56   :  { %v843_v2 = vmul.f32 1.442695, %v839_v61 }
 0xa57   :  { %v832_v28 = vpop.xlane.xlu1 %831  ;;  %v835_v62 = vpop.xlane.xlu0 %834 }
 0xa58   :  { %v841_v63 = vsub.f32 %v821_v53, %v835_v62  ;;  %v840_v0 = vsub.f32 %v816_v56, %v832_v28 }
 0xa5a   :  { %v847_v1 = vmul.f32 1.442695, %v841_v63  ;;  %v845_v22 = vmul.f32 1.442695, %v840_v0 }
 0xa5b   :  { %v838_v25 = vpop.xlane.xlu0 %837 }
 0xa5c   :  { %v842_v3 = vsub.f32 %v824_v57, %v838_v25  ;;  %1739 = vpow2.f32 %v847_v1 }
 0xa5d   :  { %1741 = vpow2.f32 %v843_v2 }
 0xa5e   :  { %v849_v4 = vmul.f32 1.442695, %v842_v3 }
 0xa60   :  { %1743 = vpow2.f32 %v849_v4 }
 0xa61   :  { %1745 = vpow2.f32 %v845_v22 }
 0xa69   :  { %v1740_v5 = vpop.eup %1739 }
 0xa6a   :  { %v857_v6 = vsel %vm76_vm0, %v1740_v5, 0.0  ;;  %v1742_v7 = vpop.eup %1741 }
 0xa6b   :  { %858 = vadd.xlane.f32.xlu0 %v857_v6  ;;  %v851_v11 = vsel %vm76_vm0, %v1742_v7, 0.0 }
 0xa6d   :  { %v1744_v8 = vpop.eup %1743 }
 0xa6e   :  { %v860_v9 = vsel %vm76_vm0, %v1744_v8, 0.0  ;;  %v1746_v10 = vpop.eup %1745 }
 0xa6f   :  { %861 = vadd.xlane.f32.xlu1 %v860_v9  ;;  %852 = vadd.xlane.f32.xlu0 %v851_v11  ;;  %v854_v13 = vsel %vm76_vm0, %v1746_v10, 0.0 }
 0xa73   :  { %855 = vadd.xlane.f32.xlu1 %v854_v13 }
 0xa84   :  { %873 = vrot.lane.b32.xlu1 %v1975_v14, %s1876_s17 }
 0xa85   :  { %875 = vrot.lane.b32.xlu0 %v1973_v12, %s1876_s17 }
 0xa88   :  { %1640 = vrot.lane.b32.xlu1 %v1639_v32, %s1877_s18 }
 0xa89   :  { %1650 = vrot.lane.b32.xlu0 %v1649_v48, %s1878_s19 }
 0xa8c   :  { %1645 = vrot.lane.b32.xlu1 %v1644_v30, %s1877_s18 }
 0xa90   :  { %1655 = vrot.lane.b32.xlu1 %v1654_v46, %s1878_s19 }
 0xaf4   :  { %v859_v15 = vpop.xlane.xlu0 %858 }
 0xaf8   :  { %v862_v16 = vpop.xlane.xlu1 %861  ;;  %v853_v23 = vpop.xlane.xlu0 %852 }
 0xaf9   :  { %1747 = vrcp.f32 %v862_v16  ;;  %v1771_v16 = vld [vmem:[%s2239_s0] sm:$0xff] }
 0xafa   :  { %1749 = vrcp.f32 %v853_v23 }
 0xafb   :  { %1751 = vrcp.f32 %v859_v15 }
 0xafc   :  { %v856_v12 = vpop.xlane.xlu1 %855  ;;  %v876_v14 = vpop.permute.xlu0 %875 }
 0xafd   :  { %1753 = vrcp.f32 %v856_v12  ;;  %1567 = vmatprep.subr.bf16.mxu1 %v876_v14 }
 0xafe   :  { %1568 = vmatpush3.bf16.msra.mxu1 %v876_v14  ;;  %v1772_v14 = vld [vmem:[%s2239_s0 + $0x10] sm:$0xff] }
 0xb00   :  { %v874_v27 = vpop.permute.xlu1 %873  ;;  %v1651_v52 = vpop.permute.xlu0 %1650 }
 0xb01   :  { %1569 = vmatprep.subr.bf16.mxu1 %v874_v27  ;;  %v1653_v61 = vunpack.i.h.bf16 %v1651_v52  ;;  %v1652_v28 = vunpack.i.l.bf16 %v1651_v52 }
 0xb02   :  { %1570 = vmatpush3.bf16.msra.mxu1 %v874_v27 }
 0xb03   :  { %1575 = vmatprep.subr.bf16.mxu1 %v1671_v37 }
 0xb04   :  { %v1641_v47 = vpop.permute.xlu1 %1640 }
 0xb05   :  { %v1643_v49 = vunpack.i.h.bf16 %v1641_v47  ;;  %v1642_v51 = vunpack.i.l.bf16 %v1641_v47 }
 0xb06   :  { %v1748_v31 = vpop.eup %1747 }
 0xb07   :  { %v1750_v32 = vpop.eup %1749  ;;  %v870_v29 = vmul.f32 %v1748_v31, %v1744_v8  ;;  %v983_v57 = vsel %vm237_vm1, %v2041_v21, %v1643_v49  ;;  %v982_v59 = vsel %vm237_vm1, %v2037_v18, %v1642_v51 }
 0xb08   :  { %v1752_v24 = vpop.eup %1751  ;;  %v867_v30 = vmul.f32 %v1750_v32, %v1742_v7  ;;  %v1646_v48 = vpop.permute.xlu1 %1645  ;;  %v987_v22 = vsel %vm986_vm2, %v982_v59, %v1652_v28  ;;  %v988_v4 = vsel %vm986_vm2, %v983_v57, %v1653_v61  ;;  %v1002_v7 = vrot.slane %v1963_v45, 3  ;;  %v1674_v59 = vld [vmem:[#allocation7] sm:$0xff]  }
 0xb09   :  { %v869_v34 = vmul.f32 %v1752_v24, %v1740_v5  ;;  %v1648_v53 = vunpack.i.h.bf16 %v1646_v48  ;;  %v1647_v54 = vunpack.i.l.bf16 %v1646_v48  ;;  %v1773_v24 = vld [vmem:[%s2239_s0 + $0x8] sm:$0xff] }
 0xb0a   :  { %v1754_v26 = vpop.eup %1753  ;;  %v1006_v8 = vrot.slane %v1002_v7, %v1961_v44 }
 0xb0b   :  { %v868_v33 = vmul.f32 %v1754_v26, %v1746_v10  ;;  %v872_v36 = vpack.c.bf16 %v870_v29, %v869_v34  ;;  %v985_v62 = vsel %vm237_vm1, %v2039_v19, %v1648_v53  ;;  %v984_v63 = vsel %vm237_vm1, %v2035_v17, %v1647_v54  ;;  %v1774_v29 = vld [vmem:[%s2239_s0 + $0x18] sm:$0xff] }
 0xb0c   :  { %v1656_v50 = vpop.permute.xlu1 %1655 }
 0xb0d   :  { %v871_v35 = vpack.c.bf16 %v868_v33, %v867_v30  ;;  %v1658_v55 = vunpack.i.h.bf16 %v1656_v50  ;;  %v1657_v56 = vunpack.i.l.bf16 %v1656_v50 }
 0xb0f   :  { %1571 = vmatprep.mubr.msk.bf16.mxu1 %vm76_vm0, %v871_v35  ;;  %v989_v1 = vsel %vm986_vm2, %v984_v63, %v1657_v56  ;;  %v990_v21 = vsel %vm986_vm2, %v985_v62, %v1658_v55 }
 0xb10   :  { %1572 = vmatmul.mubr.msk.bf16.vlgmr.msra.gmra.mxu1 %vm76_vm0, %v872_v36 }
 0xb11   :  { %1576 = vmatpush3.bf16.msra.mxu1 %v1671_v37 }
 0xb12   :  { %1577 = vmatprep.subr.bf16.mxu1 %v1672_v38 }
 0xb15   :  { %1578 = vmatpush3.bf16.msra.mxu1 %v1672_v38 }
 0xbd0   :  { %v1573_v39 = vpop.f32.mrf.mxu1 }
 0xbd2   :  { %v919_v40 = vpop.f32.mrf.mxu1 }
 0xbd4   :  { %v1574_v41 = vpop.f32.mrf.mxu1 }
 0xbd5   :  { %v1664_v42 = vpack.i.bf16 %v1574_v41, %v1573_v39 }
 0xbd6   :  { %v922_v43 = vpop.f32.mrf.mxu1 }
 0xbd7   :  { %v1659_v46 = vpack.i.bf16 %v922_v43, %v919_v40  ;;  %1665 = vrot.lane.b32.xlu1 %v1664_v42, %s1879_s20 }
 0xbd9   :  { %1660 = vrot.lane.b32.xlu0 %v1659_v46, %s1879_s20 }
 0xc49   :  { %v1666_v58 = vpop.permute.xlu1 %1665 }
 0xc4a   :  { %v1668_v60 = vunpack.i.h.bf16 %v1666_v58  ;;  %v1667_v20 = vunpack.i.l.bf16 %v1666_v58  ;;  %v1673_v58 = vld [vmem:[#allocation7 + $0x8] sm:$0xff]  }
 0xc4b   :  { %v1661_v0 = vpop.permute.xlu0 %1660  ;;  %1583 = vmatprep.subr.bf16.mxu0 %v1673_v58 }
 0xc4c   :  { %v1663_v2 = vunpack.i.h.bf16 %v1661_v0  ;;  %v1662_v25 = vunpack.i.l.bf16 %v1661_v0  ;;  %v995_v18 = vsel %vm991_vm3, %v990_v21, %v1668_v60  ;;  %v994_v3 = vsel %vm991_vm3, %v989_v1, %v1667_v20  ;;  %1584 = vmatpush3.bf16.msra.mxu0 %v1673_v58 }
 0xc4d   :  { %v997_v6 = vpack.c.bf16 %v995_v18, %v994_v3  ;;  %1585 = vmatprep.subr.bf16.mxu0 %v1674_v59  ;;  %v2191_v3 = vld [vmem:[#allocation2] sm:$0xff] }
 0xc4e   :  { %v992_v19 = vsel %vm991_vm3, %v987_v22, %v1662_v25  ;;  %v993_v5 = vsel %vm991_vm3, %v988_v4, %v1663_v2  ;;  %v1131_v22 = vrot.slane %v2191_v3, 4 }
 0xc4f   :  { %v996_v17 = vpack.c.bf16 %v993_v5, %v992_v19 }
 0xc50   :  { %1586 = vmatpush3.bf16.msra.mxu0 %v1674_v59  ;;  %v1135_v5 = vrot.slane %v1131_v22, %v1961_v44 }
 0xc51   :  { %1579 = vmatprep.mubr.msk.bf16.mxu1 %vm76_vm0, %v996_v17  ;;  %v1141_v17 = vrot.slane %v2191_v3, 5 }
 0xc52   :  { %1580 = vmatmul.mubr.msk.bf16.vlgmr.msra.gmra.mxu1 %vm76_vm0, %v997_v6 }
 0xd12   :  { %v1581_v9 = vpop.f32.mrf.mxu1 }
 0xd13   :  { %v1069_v11 = vadd.f32 %v1581_v9, %v1006_v8 }
 0xd14   :  { %v1060_v10 = vpop.f32.mrf.mxu1 }
 0xd15   :  { %v1061_v13 = vadd.f32 %v1060_v10, %v1006_v8  ;;  %v2163_v27 = vadd.f32 %v1772_v14, %v1069_v11  ;;  %v1145_v10 = vrot.slane %v1141_v17, %v1961_v44 }
 0xd16   :  { %v1582_v15 = vpop.f32.mrf.mxu1 }
 0xd17   :  { %v2158_v23 = vadd.f32 %v1771_v16, %v1061_v13  ;;  %v1072_v45 = vadd.f32 %v1582_v15, %v1006_v8  ;;  %v1085_v34 = vsel %vm76_vm0, %v2163_v27, 0.0 }
 0xd18   :  { %v1063_v12 = vpop.f32.mrf.mxu1 }
 0xd19   :  { %v1064_v31 = vadd.f32 %v1063_v12, %v1006_v8  ;;  %v1079_v32 = vsel %vm76_vm0, %v2158_v23, 0.0  ;;  %v2175_v30 = vadd.f32 %v1774_v29, %v1072_v45 }
 0xd1a   :  { %1080 = vadd.xlane.f32.xlu0 %v1079_v32 }
 0xd1b   :  { %v2170_v26 = vadd.f32 %v1773_v24, %v1064_v31  ;;  %v1088_v35 = vsel %vm76_vm0, %v2175_v30, 0.0 }
 0xd1d   :  { %v1082_v33 = vsel %vm76_vm0, %v2170_v26, 0.0 }
 0xd1e   :  { %1083 = vadd.xlane.f32.xlu1 %v1082_v33  ;;  %1086 = vadd.xlane.f32.xlu0 %v1085_v34  ;;  %v1675_v34 = vld [vmem:[%s2245_s6 + $0x38] sm:$0xff]  }
 0xd1f   :  { %1591 = vmatprep.subr.bf16.mxu1 %v1675_v34 }
 0xd20   :  { %1592 = vmatpush3.bf16.msra.mxu1 %v1675_v34 }
 0xd22   :  { %1089 = vadd.xlane.f32.xlu0 %v1088_v35  ;;  %v1676_v35 = vld [vmem:[%s2245_s6 + $0x30] sm:$0xff]  }
 0xd23   :  { %1593 = vmatprep.subr.bf16.mxu1 %v1676_v35 }
 0xd24   :  { %1594 = vmatpush3.bf16.msra.mxu1 %v1676_v35 }
 0xda3   :  { %v1081_v36 = vpop.xlane.xlu0 %1080 }
 0xda4   :  { %v1091_v37 = vmul.f32 0.03125, %v1081_v36  ;;  %v1677_v36 = vld [vmem:[%s2245_s6 + $0x28] sm:$0xff]  }
 0xda5   :  { %1595 = vmatprep.subr.bf16.mxu1 %v1677_v36 }
 0xda6   :  { %v1095_v38 = vsub.f32 %v2158_v23, %v1091_v37  ;;  %v1678_v37 = vld [vmem:[%s2245_s6 + $0x20] sm:$0xff]   ;;  %1596 = vmatpush3.bf16.msra.mxu1 %v1677_v36 }
 0xda7   :  { %v1084_v39 = vpop.xlane.xlu1 %1083  ;;  %v1087_v40 = vpop.xlane.xlu0 %1086  ;;  %1597 = vmatprep.subr.bf16.mxu1 %v1678_v37 }
 0xda8   :  { %v1092_v41 = vmul.f32 0.03125, %v1084_v39  ;;  %v1093_v42 = vmul.f32 0.03125, %v1087_v40  ;;  %v1099_v43 = vmul.f32 %v1095_v38, %v1095_v38  ;;  %v1680_v39 = vld [vmem:[%s2245_s6 + $0x10] sm:$0xff]   ;;  %v1681_v40 = vld [vmem:[%s2245_s6 + $0x8] sm:$0xff]  }
 0xdaa   :  { %v1096_v46 = vsub.f32 %v2170_v26, %v1092_v41  ;;  %v1097_v47 = vsub.f32 %v2163_v27, %v1093_v42  ;;  %v1103_v48 = vsel %vm76_vm0, %v1099_v43, 0.0  ;;  %1598 = vmatpush3.bf16.msra.mxu1 %v1678_v37  ;;  %v1682_v41 = vld [vmem:[%s2245_s6] sm:$0xff]   ;;  %v1157_v42 = vrot.slane %v2191_v3, 6 }
 0xdab   :  { %1104 = vadd.xlane.f32.xlu0 %v1103_v48  ;;  %v1090_v49 = vpop.xlane.xlu0 %1089 }
 0xdac   :  { %v1094_v50 = vmul.f32 0.03125, %v1090_v49  ;;  %v1100_v51 = vmul.f32 %v1096_v46, %v1096_v46  ;;  %v1101_v52 = vmul.f32 %v1097_v47, %v1097_v47  ;;  %v1161_v43 = vrot.slane %v1157_v42, %v1961_v44 }
 0xdae   :  { %v1098_v53 = vsub.f32 %v2175_v30, %v1094_v50  ;;  %v1106_v54 = vsel %vm76_vm0, %v1100_v51, 0.0  ;;  %v1109_v55 = vsel %vm76_vm0, %v1101_v52, 0.0 }
 0xdaf   :  { %1107 = vadd.xlane.f32.xlu1 %v1106_v54  ;;  %1110 = vadd.xlane.f32.xlu0 %v1109_v55 }
 0xdb0   :  { %v1102_v56 = vmul.f32 %v1098_v53, %v1098_v53 }
 0xdb2   :  { %v1112_v57 = vsel %vm76_vm0, %v1102_v56, 0.0 }
 0xdb3   :  { %1113 = vadd.xlane.f32.xlu1 %v1112_v57 }
 0xe34   :  { %v1105_v60 = vpop.xlane.xlu0 %1104 }
 0xe35   :  { %v1115_v20 = vmul.f32 0.03125, %v1105_v60 }
 0xe37   :  { %v1119_v61 = vadd.f32 1e-05, %v1115_v20 }
 0xe38   :  { %v1108_v28 = vpop.xlane.xlu1 %1107  ;;  %v1111_v62 = vpop.xlane.xlu0 %1110 }
 0xe39   :  { %1755 = vrsqrt.f32 %v1119_v61  ;;  %v1116_v63 = vmul.f32 0.03125, %v1108_v28  ;;  %v1117_v0 = vmul.f32 0.03125, %v1111_v62 }
 0xe3b   :  { %v1120_v1 = vadd.f32 1e-05, %v1116_v63  ;;  %v1121_v21 = vadd.f32 1e-05, %v1117_v0 }
 0xe3c   :  { %v1114_v2 = vpop.xlane.xlu1 %1113 }
 0xe3d   :  { %1757 = vrsqrt.f32 %v1120_v1  ;;  %v1118_v25 = vmul.f32 0.03125, %v1114_v2 }
 0xe3e   :  { %1759 = vrsqrt.f32 %v1121_v21 }
 0xe3f   :  { %v1122_v18 = vadd.f32 1e-05, %v1118_v25 }
 0xe41   :  { %1761 = vrsqrt.f32 %v1122_v18 }
 0xe46   :  { %v1756_v4 = vpop.eup %1755 }
 0xe47   :  { %v1127_v19 = vmul.f32 %v1756_v4, %v1095_v38  ;;  %v1679_v38 = vld [vmem:[%s2245_s6 + $0x18] sm:$0xff]   ;;  %s1880_s6 = smov [#allocation8]  }
 0xe48   :  { %1599 = vmatprep.subr.bf16.mxu1 %v1679_v38  ;;  %s1400_s1 = sshll.u32 %s1880_s6, 4  ;;  %s1401_s1 = int_to_ptr.vmem [resolvable:$true] %s1400_s1 }
 0xe49   :  { %v1137_v9 = vmul.f32 %v1135_v5, %v1127_v19  ;;  %1600 = vmatpush3.bf16.msra.mxu1 %v1679_v38  ;;  %s1836_s17 = scalar_lea.vmem %s1401_s1, 512  ;;  %p1841_p2 = scmp.lt.s32.totalorder %s1401_s1, %s1401_s1 }
 0xe4a   :  { %v1758_v6 = vpop.eup %1757  ;;  %1601 = vmatprep.subr.bf16.mxu1 %v1680_v39  ;;  %p1837_p1 = scmp.ne.s32.totalorder %s1401_s1, %s1836_s17  ;;  %p1842_p3 = scmp.lt.s32.totalorder %s1836_s17, %s1836_s17 }
 0xe4b   :  { %v1760_v7 = vpop.eup %1759  ;;  %v1128_v8 = vmul.f32 %v1758_v6, %v1096_v46  ;;  %v1147_v12 = vadd.f32 %v1145_v10, %v1137_v9 }
 0xe4c   :  { %v1129_v11 = vmul.f32 %v1760_v7, %v1097_v47  ;;  %p1843_p4 = por %p1842_p3, %p1841_p2 }
 0xe4d   :  { %v1138_v13 = vmul.f32 %v1135_v5, %v1128_v8  ;;  %1602 = vmatpush3.bf16.msra.mxu1 %v1680_v39 }
 0xe4e   :  { %v1762_v15 = vpop.eup %1761  ;;  %v1139_v45 = vmul.f32 %v1135_v5, %v1129_v11  ;;  %1603 = vmatprep.subr.bf16.mxu1 %v1681_v40  ;;  %p1844_p5 = pnand %p1843_p4, %p1837_p1 }
 0xe4f   :  { %v1130_v16 = vmul.f32 %v1762_v15, %v1098_v53  ;;  %v1148_v14 = vadd.f32 %v1145_v10, %v1138_v13 }
 0xe50   :  { %v1149_v24 = vadd.f32 %v1145_v10, %v1139_v45 }
 0xe51   :  { %v1151_v31 = vpack.c.bf16 %v1148_v14, %v1147_v12  ;;  %v1140_v32 = vmul.f32 %v1135_v5, %v1130_v16  ;;  %1604 = vmatpush3.bf16.msra.mxu1 %v1681_v40 }
 0xe52   :  { %1605 = vmatprep.subr.bf16.mxu1 %v1682_v41 }
 0xe53   :  { %1587 = vmatprep.mubr.msk.bf16.mxu0 %vm76_vm0, %v1151_v31  ;;  %v1150_v29 = vadd.f32 %v1145_v10, %v1140_v32 }
 0xe55   :  { %v1152_v33 = vpack.c.bf16 %v1150_v29, %v1149_v24  ;;  %1606 = vmatpush3.bf16.msra.mxu1 %v1682_v41  ;;  %v1284_v29 = vrot.slane %v2191_v3, 7 }
 0xe57   :  { %1588 = vmatmul.mubr.msk.bf16.vlgmr.msra.gmra.mxu0 %vm76_vm0, %v1152_v33  ;;  %v1288_v33 = vrot.slane %v1284_v29, %v1961_v44 }
 0xf17   :  { %v1589_v46 = vpop.f32.mrf.mxu0 }
 0xf18   :  { %v1224_v47 = vadd.f32 %v1589_v46, %v1161_v43 }
 0xf19   :  { %v1215_v48 = vpop.f32.mrf.mxu0 }
 0xf1a   :  { %v1236_v49 = vmul.f32 0.044715, %v1224_v47  ;;  %v1216_v50 = vadd.f32 %v1215_v48, %v1161_v43  ;;  %v1232_v16 = vmul.f32 0.5, %v1224_v47 }
 0xf1b   :  { %v1590_v51 = vpop.f32.mrf.mxu0 }
 0xf1c   :  { %v1240_v52 = vmul.f32 %v1236_v49, %v1224_v47  ;;  %v1234_v53 = vmul.f32 0.044715, %v1216_v50  ;;  %v1227_v54 = vadd.f32 %v1590_v51, %v1161_v43  ;;  %v1230_v11 = vmul.f32 0.5, %v1216_v50 }
 0xf1d   :  { %v1218_v55 = vpop.f32.mrf.mxu0 }
 0xf1e   :  { %v1244_v56 = vmul.f32 %v1240_v52, %v1224_v47  ;;  %v1238_v57 = vmul.f32 %v1234_v53, %v1216_v50  ;;  %v1237_v58 = vmul.f32 0.044715, %v1227_v54  ;;  %v1219_v59 = vadd.f32 %v1218_v55, %v1161_v43 }
 0xf1f   :  { %v1233_v9 = vmul.f32 0.5, %v1227_v54 }
 0xf20   :  { %v1248_v60 = vadd.f32 %v1244_v56, %v1224_v47  ;;  %v1242_v20 = vmul.f32 %v1238_v57, %v1216_v50  ;;  %v1241_v61 = vmul.f32 %v1237_v58, %v1227_v54  ;;  %v1235_v28 = vmul.f32 0.044715, %v1219_v59 }
 0xf21   :  { %v1231_v13 = vmul.f32 0.5, %v1219_v59 }
 0xf22   :  { %v1245_v62 = vmul.f32 %v1241_v61, %v1227_v54  ;;  %v1239_v63 = vmul.f32 %v1235_v28, %v1219_v59  ;;  %v1246_v0 = vadd.f32 %v1242_v20, %v1216_v50  ;;  %v1252_v1 = vmul.f32 0.7978846, %v1248_v60 }
 0xf24   :  { %v1249_v21 = vadd.f32 %v1245_v62, %v1227_v54  ;;  %v1243_v2 = vmul.f32 %v1239_v63, %v1219_v59  ;;  %v1250_v25 = vmul.f32 0.7978846, %v1246_v0 }
 0xf26   :  { %v1253_v18 = vmul.f32 0.7978846, %v1249_v21  ;;  %v1247_v22 = vadd.f32 %v1243_v2, %v1219_v59  ;;  %1763 = vtanh.f32 %v1250_v25 }
 0xf27   :  { %1765 = vtanh.f32 %v1252_v1 }
 0xf28   :  { %1767 = vtanh.f32 %v1253_v18  ;;  %v1251_v4 = vmul.f32 0.7978846, %v1247_v22 }
 0xf2a   :  { %1769 = vtanh.f32 %v1251_v4 }
 0xf33   :  { %v1764_v19 = vpop.eup %1763 }
 0xf34   :  { %v1766_v5 = vpop.eup %1765  ;;  %v1258_v6 = vadd.f32 1.0, %v1764_v19 }
 0xf35   :  { %v1768_v17 = vpop.eup %1767  ;;  %v1260_v10 = vadd.f32 1.0, %v1766_v5 }
 0xf36   :  { %v1261_v7 = vadd.f32 1.0, %v1768_v17  ;;  %v1262_v14 = vmul.f32 %v1258_v6, %v1230_v11 }
 0xf37   :  { %v1770_v8 = vpop.eup %1769  ;;  %v1264_v31 = vmul.f32 %v1260_v10, %v1232_v16 }
 0xf38   :  { %v1259_v15 = vadd.f32 1.0, %v1770_v8  ;;  %v1265_v12 = vmul.f32 %v1261_v7, %v1233_v9 }
 0xf3a   :  { %v1263_v45 = vmul.f32 %v1259_v15, %v1231_v13  ;;  %v1267_v24 = vpack.c.bf16 %v1265_v12, %v1264_v31 }
 0xf3c   :  { %v1266_v32 = vpack.c.bf16 %v1263_v45, %v1262_v14 }
 0xf3e   :  { %1607 = vmatprep.mubr.bf16.mxu1 %v1266_v32 }
 0xf3f   :  { %1608 = vmatmul.mubr.bf16.vlgmr.msra.gmra.mxu1 %v1267_v24 }
 0xfff   :  { %v1609_v34 = vpop.f32.mrf.mxu1 }
0x1000   :  { %v1381_v35 = vadd.f32 %v1609_v34, %v1288_v33 }
0x1001   :  { %v1372_v36 = vpop.f32.mrf.mxu1 }
0x1002   :  { %v1389_v37 = vadd.f32 %v1381_v35, %v2163_v27  ;;  %v1373_v38 = vadd.f32 %v1372_v36, %v1288_v33 }
0x1003   :  { %v1610_v39 = vpop.f32.mrf.mxu1 }
0x1004   :  { %1393 = vst.msk [vmem:[#allocation8 + $0x10] sm:$0xff] %vm76_vm0, %v1389_v37  ;;  %v1387_v40 = vadd.f32 %v1373_v38, %v2158_v23  ;;  %v1384_v41 = vadd.f32 %v1610_v39, %v1288_v33 }
0x1005   :  { %v1375_v42 = vpop.f32.mrf.mxu1 }
0x1006   :  { %1391 = vst.msk [vmem:[#allocation8] sm:$0xff] %vm76_vm0, %v1387_v40  ;;  %v1390_v3 = vadd.f32 %v1384_v41, %v2175_v30  ;;  %v1376_v44 = vadd.f32 %v1375_v42, %v1288_v33 }
0x1008   :  { %1394 = vst.msk [vmem:[#allocation8 + $0x18] sm:$0xff] %vm76_vm0, %v1390_v3  ;;  %v1388_v43 = vadd.f32 %v1376_v44, %v2170_v26 }
0x100a   :  { %1392 = vst.msk [vmem:[#allocation8 + $0x8] sm:$0xff] %vm76_vm0, %v1388_v43 }
0x100b   :  { %1847 = shalt.err (!%p1844_p5)
}
0x100c   :  { %s1881_s19 = smov 128  }
0x100d   :  { %1406 = dma.vmem_to_hbm [thread:$0]  %s1401_s1, 512, %s2246_s7, [#allocation4], %s1881_s19, %s1881_s19, %s1877_s18  }
0x100e   :  { %1860 = dma.done.wait [#allocation4], 512  }
0x100f   :  { %1861 = vsyncadd [#allocation4], 4294966784 }
0x1010   :  { %1410 = vsyncpa [#allocation3], 1 }
0x1011   :  { %1411 = vsyncpa [#allocation6], 1 }
0x1012   :  { %1412 = vsyncpa [#allocation4], 1 }

</bundles_post_ra>
